<compile_context>
chip_gen: v7x
topology: tpu7x:2x2x1
jax: 0.10.0
libtpu: 0.0.40
codegen_flags: <defaults>
</compile_context>

<pallas_src>
import numpy as np
import jax
import jax.numpy as jnp
from jax.experimental import pallas as pl
from jax.experimental.pallas import tpu as pltpu

# ---------------- model sizes (small, consistent with the module) ----------------
H = 32            # h_size
X = 32            # x_size
NUM_CLASSES = 4
VOCAB = 100
C_PAD = 128       # lane-dense classifier output width (sliced to NUM_CLASSES outside)
B_CHUNK = 8       # trees per grid step (one sublane-aligned row group per node)


# ----------------------- level-batched topology schedule -------------------------
def build_level_schedule(steps, n_nodes):
    """Level-major node permutation for level-batched tree propagation.

    Returns (perm, widths, offsets):
      perm[pos]  = original node id stored at scratch position `pos`
      widths[L]  = number of nodes at level L (level 0 = leaves)
      offsets[L] = first scratch position of level L
    Layout invariant: the left children of level L's parents occupy positions
    [offsets[L-1], offsets[L-1]+widths[L]) and the right children the following
    widths[L] positions, both in parent-slot order (so per-level child gathers
    are contiguous static slices).
    """
    children = {}
    for p, l, r in steps:
        assert p not in children, "node appears twice as a parent"
        children[p] = (l, r)

    depth = {}
    def node_depth(n):
        if n in depth:
            return depth[n]
        if n not in children:
            depth[n] = 0
        else:
            l, r = children[n]
            dl, dr = node_depth(l), node_depth(r)
            # TODO(synk): unbalanced trees (children at different depths) would need
            # per-node gathers / padding; only level-balanced topologies supported.
            assert dl == dr, "level batching requires balanced children depths"
            depth[n] = dl + 1
        return depth[n]

    max_depth = max(node_depth(n) for n in range(n_nodes))
    levels = [[] for _ in range(max_depth + 1)]
    levels[max_depth] = [n for n in range(n_nodes) if depth[n] == max_depth]
    for L in range(max_depth, 0, -1):
        left = [children[p][0] for p in levels[L]]
        right = [children[p][1] for p in levels[L]]
        levels[L - 1] = left + right
    perm = [n for lvl in levels for n in lvl]
    # every node written exactly once (leaves by init, internals by their level step)
    assert sorted(perm) == list(range(n_nodes)), "schedule must cover every node once"
    widths = [len(lvl) for lvl in levels]
    offsets = np.concatenate([[0], np.cumsum(widths)[:-1]]).astype(int).tolist()
    return perm, widths, offsets


# ------------------------------ fused forward kernel ------------------------------
def _build_fused_forward(n_nodes, n_leaves, widths, offsets, n_chunks):
    B = B_CHUNK
    NB = n_nodes * B           # rows per chunk (all nodes)
    NLB = n_leaves * B         # rows per chunk (leaf nodes only)
    depth = len(widths) - 1

    def kernel(x_ref, mask_ref, c0_ref,                   # leaf rows: (NLB,X) (NLB,1) (NLB,H)
               w_in_ref, b_in_ref, w_iou_ref, b_iou_ref,  # leaf-path weights
               w_cell_ref, b_cell_ref,                    # fused [U_f | U_iou] weights
               w_out_ref, b_out_ref,                      # padded classifier weights
               out_ref,                                   # (NB, C_PAD)
               h_buf, c_buf):                             # VMEM scratch (NB, H)
        # ---- leaf init (apply_node_func on W_iou(z)*mask).  Only leaf rows: internal
        #      rows are always overwritten by the tree loop, so their init is dead.
        #      NOTE: mask multiplies BEFORE b_iou is added -- this matches the
        #      reference exactly because W_iou is bias-free and b_iou is added inside
        #      apply_node_func; do not "simplify" by moving the mask after the bias.
        z = jnp.dot(x_ref[...], w_in_ref[...],
                    preferred_element_type=jnp.float32) + b_in_ref[...]
        z = jnp.maximum(z, 0.0)
        iou = (jnp.dot(z, w_iou_ref[...], preferred_element_type=jnp.float32)
               * mask_ref[...] + b_iou_ref[...])
        io = jax.nn.sigmoid(iou[:, :2 * H])               # one EUP issue for i|o lanes
        i0 = io[:, :H]
        o0 = io[:, H:]
        u0 = jnp.tanh(iou[:, 2 * H:])
        c_init = i0 * u0 + c0_ref[...]
        h_buf[0:NLB, :] = o0 * jnp.tanh(c_init)
        c_buf[0:NLB, :] = c_init

        # weights loaded once, reused across all levels.  No concat of [h_l, h_r]:
        # split into two matmuls accumulating into the same (rows, 5H) result.
        w_l = w_cell_ref[:H, :]          # (H, 5H) multiplies left-child h
        w_r = w_cell_ref[H:, :]          # (H, 5H) multiplies right-child h
        b_cell = b_cell_ref[...]         # (1, 5H) = [U_f bias | b_iou]

        # ---- level-batched tree propagation: one matmul pair + one contiguous store
        #      per level.  All offsets are static Python ints (topology baked in).
        for lvl in range(1, depth + 1):
            W = widths[lvl]                      # parents at this level
            co = offsets[lvl - 1] * B            # child-level row offset
            po = offsets[lvl] * B                # parent-level row offset
            hl = h_buf[co:co + W * B, :]
            hr = h_buf[co + W * B:co + 2 * W * B, :]
            cl = c_buf[co:co + W * B, :]
            cr = c_buf[co + W * B:co + 2 * W * B, :]
            pre = (jnp.dot(hl, w_l, preferred_element_type=jnp.float32)
                   + jnp.dot(hr, w_r, preferred_element_type=jnp.float32)
                   + b_cell)                                   # (W*B, 5H) = [f_l|f_r|i|o|u]
            sig = jax.nn.sigmoid(pre[:, :4 * H])               # single full-lane sigmoid
            f_l = sig[:, 0 * H:1 * H]
            f_r = sig[:, 1 * H:2 * H]
            i_g = sig[:, 2 * H:3 * H]
            o_g = sig[:, 3 * H:4 * H]
            u_g = jnp.tanh(pre[:, 4 * H:5 * H])
            c_new = i_g * u_g + f_l * cl + f_r * cr
            h_buf[po:po + W * B, :] = o_g * jnp.tanh(c_new)
            c_buf[po:po + W * B, :] = c_new

        # ---- lane-dense classifier: (NB, H) @ (H, 128) + (1, 128)
        out_ref[...] = (jnp.dot(h_buf[...], w_out_ref[...],
                                preferred_element_type=jnp.float32) + b_out_ref[...])

    grid_spec = pltpu.PrefetchScalarGridSpec(
        num_scalar_prefetch=0,
        grid=(n_chunks,),                                  # "parallel": uses both TCs on v7x
        in_specs=[
            pl.BlockSpec((NLB, X), lambda i: (i, 0)),      # x (leaf rows of this chunk)
            pl.BlockSpec((NLB, 1), lambda i: (i, 0)),      # mask (leaf rows)
            pl.BlockSpec((NLB, H), lambda i: (i, 0)),      # c0 (leaf rows)
            pl.BlockSpec((X, H), lambda i: (0, 0)),        # w_in
            pl.BlockSpec((1, H), lambda i: (0, 0)),        # b_in
            pl.BlockSpec((H, 3 * H), lambda i: (0, 0)),    # w_iou
            pl.BlockSpec((1, 3 * H), lambda i: (0, 0)),    # b_iou
            pl.BlockSpec((2 * H, 5 * H), lambda i: (0, 0)),# fused [U_f | U_iou]
            pl.BlockSpec((1, 5 * H), lambda i: (0, 0)),    # fused bias
            pl.BlockSpec((H, C_PAD), lambda i: (0, 0)),    # padded classifier W
            pl.BlockSpec((1, C_PAD), lambda i: (0, 0)),    # padded classifier b
        ],
        out_specs=pl.BlockSpec((NB, C_PAD), lambda i: (i, 0)),
        scratch_shapes=[pltpu.VMEM((NB, H), jnp.float32),
                        pltpu.VMEM((NB, H), jnp.float32)],
    )
    return pl.pallas_call(
        kernel,
        grid_spec=grid_spec,
        out_shape=jax.ShapeDtypeStruct((n_chunks * NB, C_PAD), jnp.float32),
        compiler_params=pltpu.CompilerParams(dimension_semantics=("parallel",)),
    )


# --------------------------------- full forward ----------------------------------
def tree_lstm_forward(params, x_ids, mask, c0, steps, n_nodes, batch):
    """x_ids: (N, B) int32 (PAD for internal nodes); mask: (N, 1); c0: (N, B, H);
    steps: list of (parent, left, right) with children topologically earlier."""
    assert batch % B_CHUNK == 0
    n_chunks = batch // B_CHUNK
    perm, widths, offsets = build_level_schedule(steps, n_nodes)
    n_leaves = widths[0]
    leaf_perm = np.asarray(perm[:n_leaves])
    inv_perm = np.argsort(np.asarray(perm))          # original node id -> scratch position

    def chunk_rows(a):
        # (rows, batch, D) -> (n_chunks * rows * B_CHUNK, D): chunk-major, node-major.
        r, _, d = a.shape
        return (a.reshape(r, n_chunks, B_CHUNK, d)
                 .transpose(1, 0, 2, 3)
                 .reshape(n_chunks * r * B_CHUNK, d))

    # embedding gather + layout plumbing (glue; all matmul/gate math runs in the kernel)
    x_vecs = jnp.take(params["emb"], x_ids, axis=0)                        # (N, B, X)
    x_leaf = chunk_rows(x_vecs[leaf_perm])                                 # leaf rows only
    mask_leaf = chunk_rows(jnp.broadcast_to(mask[leaf_perm][:, None, :],
                                            (n_leaves, batch, 1)))
    c0_leaf = chunk_rows(c0[leaf_perm])
    # fuse U_f (2H,2H) and U_iou (2H,3H) into one (2H,5H) weight; columns = [f_l|f_r|i|o|u]
    w_cell = jnp.concatenate([params["uf_w"], params["uiou_w"]], axis=1)
    b_cell = jnp.concatenate([params["uf_b"], params["b_iou"]], axis=1)
    # pad classifier to 128 output lanes (lane-dense store; sliced back below)
    w_out_pad = jnp.zeros((H, C_PAD), jnp.float32).at[:, :NUM_CLASSES].set(params["w_out"])
    b_out_pad = jnp.zeros((1, C_PAD), jnp.float32).at[:, :NUM_CLASSES].set(params["b_out"])

    fused = _build_fused_forward(n_nodes, n_leaves, widths, offsets, n_chunks)
    logits_pad = fused(x_leaf, mask_leaf, c0_leaf,
                       params["w_in"], params["b_in"],
                       params["w_iou"], params["b_iou"],
                       w_cell, b_cell, w_out_pad, b_out_pad)
    # (n_chunks * N * B_CHUNK, 128) -> (B, N, NUM_CLASSES) in original node order.
    out = logits_pad.reshape(n_chunks, n_nodes, B_CHUNK, C_PAD)[:, :, :, :NUM_CLASSES]
    out = out[:, inv_perm]                     # scratch position -> original node id
    return out.transpose(0, 2, 1, 3).reshape(batch, n_nodes, NUM_CLASSES)


# ---------------------------- pure-JAX reference ----------------------------------
def tree_lstm_reference(params, x_ids, mask, c0, steps):
    hp = jax.lax.Precision.HIGHEST
    x_vecs = jnp.take(params["emb"], x_ids, axis=0)                        # (N, B, X)
    z = jnp.maximum(jnp.einsum("nbx,xh->nbh", x_vecs, params["w_in"],
                               precision=hp) + params["b_in"], 0.0)
    iou = (jnp.einsum("nbh,hk->nbk", z, params["w_iou"], precision=hp)
           * mask[:, None, :] + params["b_iou"])
    i = jax.nn.sigmoid(iou[..., :H])
    o = jax.nn.sigmoid(iou[..., H:2 * H])
    u = jnp.tanh(iou[..., 2 * H:])
    c = i * u + c0
    h = o * jnp.tanh(c)
    for p, l, r in steps:
        h_cat = jnp.concatenate([h[l], h[r]], axis=-1)                     # (B, 2H)
        f = jax.nn.sigmoid(jnp.dot(h_cat, params["uf_w"], precision=hp) + params["uf_b"])
        c_sum = f[:, :H] * c[l] + f[:, H:] * c[r]
        iou_p = jnp.dot(h_cat, params["uiou_w"], precision=hp) + params["b_iou"]
        ip = jax.nn.sigmoid(iou_p[:, :H])
        op = jax.nn.sigmoid(iou_p[:, H:2 * H])
        up = jnp.tanh(iou_p[:, 2 * H:])
        c_new = ip * up + c_sum
        h_new = op * jnp.tanh(c_new)
        h = h.at[p].set(h_new)
        c = c.at[p].set(c_new)
    logits = jnp.einsum("nbh,hc->nbc", h, params["w_out"], precision=hp) + params["b_out"]
    return logits.transpose(1, 0, 2)


# ------------------------------------ main ----------------------------------------
if __name__ == "__main__":
    key = jax.random.PRNGKey(0)
    ks = jax.random.split(key, 8)

    # deterministic parameters (PyTorch Linear(in,out) stored here as (in,out))
    params = {
        "emb":    jax.random.normal(ks[0], (VOCAB, X), jnp.float32) * 0.1,
        "w_in":   jax.random.normal(ks[1], (X, H), jnp.float32) * 0.1,          # linear_input
        "b_in":   jnp.zeros((1, H), jnp.float32),
        "w_iou":  jax.random.normal(ks[2], (H, 3 * H), jnp.float32) * 0.1,      # W_iou (no bias)
        "uiou_w": jax.random.normal(ks[3], (2 * H, 3 * H), jnp.float32) * 0.1,  # U_iou (no bias)
        "uf_w":   jax.random.normal(ks[4], (2 * H, 2 * H), jnp.float32) * 0.1,  # U_f
        "uf_b":   jnp.zeros((1, 2 * H), jnp.float32),
        "b_iou":  jnp.zeros((1, 3 * H), jnp.float32),
        "w_out":  jax.random.normal(ks[5], (H, NUM_CLASSES), jnp.float32) * 0.1,
        "b_out":  jnp.zeros((1, NUM_CLASSES), jnp.float32),
    }

    # 16 trees (2 chunks x 8, one chunk per grid step) sharing one topology:
    # complete binary tree, 8 leaves (0..7), internal nodes 8..14, root = 14.
    total_B = 2 * B_CHUNK
    n_leaves, n_nodes = 8, 15
    steps = [(8, 0, 1), (9, 2, 3), (10, 4, 5), (11, 6, 7),
             (12, 8, 9), (13, 10, 11), (14, 12, 13)]

    leaf_ids = jax.random.randint(ks[6], (n_leaves, total_B), 1, VOCAB)
    x_ids = jnp.concatenate(
        [leaf_ids, jnp.zeros((n_nodes - n_leaves, total_B), jnp.int32)], axis=0)  # PAD internal
    mask = jnp.concatenate([jnp.ones((n_leaves, 1), jnp.float32),
                            jnp.zeros((n_nodes - n_leaves, 1), jnp.float32)], axis=0)
    c0 = jnp.zeros((n_nodes, total_B, H), jnp.float32)

    logits = tree_lstm_forward(params, x_ids, mask, c0, steps, n_nodes, total_B)
    logits = jax.block_until_ready(logits)
    assert logits.shape == (total_B, n_nodes, NUM_CLASSES)
    assert bool(jnp.all(jnp.isfinite(logits)))

    ref = tree_lstm_reference(params, x_ids, mask, c0, steps)
    np.testing.assert_allclose(np.asarray(logits), np.asarray(ref), rtol=5e-3, atol=5e-3)
    print("KERNEL_OK")
</pallas_src>

<mosaic_0001>
module attributes {stable_mosaic.version = 11 : i64} {
  func.func @kernel(%arg0: i32, %arg1: memref<64x32xf32, #tpu.memory_space<vmem>>, %arg2: memref<64x1xf32, #tpu.memory_space<vmem>>, %arg3: memref<64x32xf32, #tpu.memory_space<vmem>>, %arg4: memref<32x32xf32, #tpu.memory_space<vmem>>, %arg5: memref<1x32xf32, #tpu.memory_space<vmem>>, %arg6: memref<32x96xf32, #tpu.memory_space<vmem>>, %arg7: memref<1x96xf32, #tpu.memory_space<vmem>>, %arg8: memref<64x160xf32, #tpu.memory_space<vmem>>, %arg9: memref<1x160xf32, #tpu.memory_space<vmem>>, %arg10: memref<32x128xf32, #tpu.memory_space<vmem>>, %arg11: memref<1x128xf32, #tpu.memory_space<vmem>>, %arg12: memref<120x128xf32, #tpu.memory_space<vmem>>, %arg13: memref<120x32xf32, #tpu.memory_space<vmem>>, %arg14: memref<120x32xf32, #tpu.memory_space<vmem>>) attributes {dimension_semantics = [#tpu.dimension_semantics<parallel>], iteration_bounds = array<i64: 2>, scalar_prefetch = 0 : i64, scratch_operands = 2 : i64, tpu.core_type = #tpu.core_type<tc>, window_params = [{transform_indices = @transform_0, window_bounds = array<i64: 64, 32>}, {transform_indices = @transform_1, window_bounds = array<i64: 64, 1>}, {transform_indices = @transform_2, window_bounds = array<i64: 64, 32>}, {pipeline_mode = #tpu.pipeline_mode<synchronous>, transform_indices = @transform_3, window_bounds = array<i64: 32, 32>}, {pipeline_mode = #tpu.pipeline_mode<synchronous>, transform_indices = @transform_4, window_bounds = array<i64: 1, 32>}, {pipeline_mode = #tpu.pipeline_mode<synchronous>, transform_indices = @transform_5, window_bounds = array<i64: 32, 96>}, {pipeline_mode = #tpu.pipeline_mode<synchronous>, transform_indices = @transform_6, window_bounds = array<i64: 1, 96>}, {pipeline_mode = #tpu.pipeline_mode<synchronous>, transform_indices = @transform_7, window_bounds = array<i64: 64, 160>}, {pipeline_mode = #tpu.pipeline_mode<synchronous>, transform_indices = @transform_8, window_bounds = array<i64: 1, 160>}, {pipeline_mode = #tpu.pipeline_mode<synchronous>, transform_indices = @transform_9, window_bounds = array<i64: 32, 128>}, {pipeline_mode = #tpu.pipeline_mode<synchronous>, transform_indices = @transform_10, window_bounds = array<i64: 1, 128>}, {transform_indices = @transform_11, window_bounds = array<i64: 120, 128>}]} {
    %c0 = arith.constant 0 : index
    %c0_0 = arith.constant 0 : index
    %0 = vector.load %arg1[%c0, %c0_0] : memref<64x32xf32, #tpu.memory_space<vmem>>, vector<64x32xf32>
    %c0_1 = arith.constant 0 : index
    %c0_2 = arith.constant 0 : index
    %1 = vector.load %arg4[%c0_1, %c0_2] : memref<32x32xf32, #tpu.memory_space<vmem>>, vector<32x32xf32>
    %cst = arith.constant dense<0.000000e+00> : vector<64x32xf32>
    %2 = tpu.matmul %0, %1, %cst {dimension_numbers = #tpu.dot_dimension_numbers<[1], [0], [0], [1], [0, 0, 1, 1], [], []>} : vector<64x32xf32>, vector<32x32xf32>, vector<64x32xf32> -> vector<64x32xf32>
    %c0_3 = arith.constant 0 : index
    %c0_4 = arith.constant 0 : index
    %3 = vector.load %arg5[%c0_3, %c0_4] : memref<1x32xf32, #tpu.memory_space<vmem>>, vector<1x32xf32>
    %4 = vector.broadcast %3 : vector<1x32xf32> to vector<64x32xf32>
    %5 = arith.addf %2, %4 : vector<64x32xf32>
    %cst_5 = arith.constant 0.000000e+00 : f32
    %6 = vector.broadcast %cst_5 : f32 to vector<64x32xf32>
    %7 = arith.maximumf %5, %6 : vector<64x32xf32>
    %c0_6 = arith.constant 0 : index
    %c0_7 = arith.constant 0 : index
    %8 = vector.load %arg6[%c0_6, %c0_7] : memref<32x96xf32, #tpu.memory_space<vmem>>, vector<32x96xf32>
    %cst_8 = arith.constant dense<0.000000e+00> : vector<64x96xf32>
    %9 = tpu.matmul %7, %8, %cst_8 {dimension_numbers = #tpu.dot_dimension_numbers<[1], [0], [0], [1], [0, 0, 1, 1], [], []>} : vector<64x32xf32>, vector<32x96xf32>, vector<64x96xf32> -> vector<64x96xf32>
    %c0_9 = arith.constant 0 : index
    %c0_10 = arith.constant 0 : index
    %10 = vector.load %arg2[%c0_9, %c0_10] : memref<64x1xf32, #tpu.memory_space<vmem>>, vector<64x1xf32>
    %11 = vector.broadcast %10 : vector<64x1xf32> to vector<64x96xf32>
    %12 = arith.mulf %9, %11 : vector<64x96xf32>
    %c0_11 = arith.constant 0 : index
    %c0_12 = arith.constant 0 : index
    %13 = vector.load %arg7[%c0_11, %c0_12] : memref<1x96xf32, #tpu.memory_space<vmem>>, vector<1x96xf32>
    %14 = vector.broadcast %13 : vector<1x96xf32> to vector<64x96xf32>
    %15 = arith.addf %12, %14 : vector<64x96xf32>
    %16 = vector.extract_strided_slice %15 {offsets = [0, 0], sizes = [64, 64], strides = [1, 1]} : vector<64x96xf32> to vector<64x64xf32>
    %17 = arith.negf %16 : vector<64x64xf32>
    %18 = math.exp %17 : vector<64x64xf32>
    %cst_13 = arith.constant 1.000000e+00 : f32
    %19 = vector.broadcast %cst_13 : f32 to vector<64x64xf32>
    %20 = arith.addf %19, %18 : vector<64x64xf32>
    %21 = arith.divf %19, %20 : vector<64x64xf32>
    %22 = vector.extract_strided_slice %21 {offsets = [0, 0], sizes = [64, 32], strides = [1, 1]} : vector<64x64xf32> to vector<64x32xf32>
    %23 = vector.extract_strided_slice %21 {offsets = [0, 32], sizes = [64, 32], strides = [1, 1]} : vector<64x64xf32> to vector<64x32xf32>
    %24 = vector.extract_strided_slice %15 {offsets = [0, 64], sizes = [64, 32], strides = [1, 1]} : vector<64x96xf32> to vector<64x32xf32>
    %25 = math.tanh %24 : vector<64x32xf32>
    %26 = arith.mulf %22, %25 : vector<64x32xf32>
    %c0_14 = arith.constant 0 : index
    %c0_15 = arith.constant 0 : index
    %27 = vector.load %arg3[%c0_14, %c0_15] : memref<64x32xf32, #tpu.memory_space<vmem>>, vector<64x32xf32>
    %28 = arith.addf %26, %27 : vector<64x32xf32>
    %29 = math.tanh %28 : vector<64x32xf32>
    %30 = arith.mulf %23, %29 : vector<64x32xf32>
    %c0_16 = arith.constant 0 : index
    %c0_17 = arith.constant 0 : index
    %31 = vector.load %arg13[%c0_16, %c0_17] : memref<120x32xf32, #tpu.memory_space<vmem>>, vector<64x32xf32>
    tpu.vector_store %arg13[%c0_16, %c0_17], %30 {strides = array<i32>} : memref<120x32xf32, #tpu.memory_space<vmem>>, vector<64x32xf32>,
    %c0_18 = arith.constant 0 : index
    %c0_19 = arith.constant 0 : index
    %32 = vector.load %arg14[%c0_18, %c0_19] : memref<120x32xf32, #tpu.memory_space<vmem>>, vector<64x32xf32>
    tpu.vector_store %arg14[%c0_18, %c0_19], %28 {strides = array<i32>} : memref<120x32xf32, #tpu.memory_space<vmem>>, vector<64x32xf32>,
    %c0_20 = arith.constant 0 : index
    %c0_21 = arith.constant 0 : index
    %33 = vector.load %arg8[%c0_20, %c0_21] : memref<64x160xf32, #tpu.memory_space<vmem>>, vector<32x160xf32>
    %c32 = arith.constant 32 : index
    %c0_22 = arith.constant 0 : index
    %34 = vector.load %arg8[%c32, %c0_22] : memref<64x160xf32, #tpu.memory_space<vmem>>, vector<32x160xf32>
    %c0_23 = arith.constant 0 : index
    %c0_24 = arith.constant 0 : index
    %35 = vector.load %arg9[%c0_23, %c0_24] : memref<1x160xf32, #tpu.memory_space<vmem>>, vector<1x160xf32>
    %c0_25 = arith.constant 0 : index
    %c0_26 = arith.constant 0 : index
    %36 = vector.load %arg13[%c0_25, %c0_26] : memref<120x32xf32, #tpu.memory_space<vmem>>, vector<32x32xf32>
    %c32_27 = arith.constant 32 : index
    %c0_28 = arith.constant 0 : index
    %37 = vector.load %arg13[%c32_27, %c0_28] : memref<120x32xf32, #tpu.memory_space<vmem>>, vector<32x32xf32>
    %c0_29 = arith.constant 0 : index
    %c0_30 = arith.constant 0 : index
    %38 = vector.load %arg14[%c0_29, %c0_30] : memref<120x32xf32, #tpu.memory_space<vmem>>, vector<32x32xf32>
    %c32_31 = arith.constant 32 : index
    %c0_32 = arith.constant 0 : index
    %39 = vector.load %arg14[%c32_31, %c0_32] : memref<120x32xf32, #tpu.memory_space<vmem>>, vector<32x32xf32>
    %cst_33 = arith.constant dense<0.000000e+00> : vector<32x160xf32>
    %40 = tpu.matmul %36, %33, %cst_33 {dimension_numbers = #tpu.dot_dimension_numbers<[1], [0], [0], [1], [0, 0, 1, 1], [], []>} : vector<32x32xf32>, vector<32x160xf32>, vector<32x160xf32> -> vector<32x160xf32>
    %cst_34 = arith.constant dense<0.000000e+00> : vector<32x160xf32>
    %41 = tpu.matmul %37, %34, %cst_34 {dimension_numbers = #tpu.dot_dimension_numbers<[1], [0], [0], [1], [0, 0, 1, 1], [], []>} : vector<32x32xf32>, vector<32x160xf32>, vector<32x160xf32> -> vector<32x160xf32>
    %42 = arith.addf %40, %41 : vector<32x160xf32>
    %43 = vector.broadcast %35 : vector<1x160xf32> to vector<32x160xf32>
    %44 = arith.addf %42, %43 : vector<32x160xf32>
    %45 = vector.extract_strided_slice %44 {offsets = [0, 0], sizes = [32, 128], strides = [1, 1]} : vector<32x160xf32> to vector<32x128xf32>
    %46 = arith.negf %45 : vector<32x128xf32>
    %47 = math.exp %46 : vector<32x128xf32>
    %cst_35 = arith.constant 1.000000e+00 : f32
    %48 = vector.broadcast %cst_35 : f32 to vector<32x128xf32>
    %49 = arith.addf %48, %47 : vector<32x128xf32>
    %50 = arith.divf %48, %49 : vector<32x128xf32>
    %51 = vector.extract_strided_slice %50 {offsets = [0, 0], sizes = [32, 32], strides = [1, 1]} : vector<32x128xf32> to vector<32x32xf32>
    %52 = vector.extract_strided_slice %50 {offsets = [0, 32], sizes = [32, 32], strides = [1, 1]} : vector<32x128xf32> to vector<32x32xf32>
    %53 = vector.extract_strided_slice %50 {offsets = [0, 64], sizes = [32, 32], strides = [1, 1]} : vector<32x128xf32> to vector<32x32xf32>
    %54 = vector.extract_strided_slice %50 {offsets = [0, 96], sizes = [32, 32], strides = [1, 1]} : vector<32x128xf32> to vector<32x32xf32>
    %55 = vector.extract_strided_slice %44 {offsets = [0, 128], sizes = [32, 32], strides = [1, 1]} : vector<32x160xf32> to vector<32x32xf32>
    %56 = math.tanh %55 : vector<32x32xf32>
    %57 = arith.mulf %53, %56 : vector<32x32xf32>
    %58 = arith.mulf %51, %38 : vector<32x32xf32>
    %59 = arith.addf %57, %58 : vector<32x32xf32>
    %60 = arith.mulf %52, %39 : vector<32x32xf32>
    %61 = arith.addf %59, %60 : vector<32x32xf32>
    %62 = math.tanh %61 : vector<32x32xf32>
    %63 = arith.mulf %54, %62 : vector<32x32xf32>
    %c64 = arith.constant 64 : index
    %c0_36 = arith.constant 0 : index
    %64 = vector.load %arg13[%c64, %c0_36] : memref<120x32xf32, #tpu.memory_space<vmem>>, vector<32x32xf32>
    tpu.vector_store %arg13[%c64, %c0_36], %63 {strides = array<i32>} : memref<120x32xf32, #tpu.memory_space<vmem>>, vector<32x32xf32>,
    %c64_37 = arith.constant 64 : index
    %c0_38 = arith.constant 0 : index
    %65 = vector.load %arg14[%c64_37, %c0_38] : memref<120x32xf32, #tpu.memory_space<vmem>>, vector<32x32xf32>
    tpu.vector_store %arg14[%c64_37, %c0_38], %61 {strides = array<i32>} : memref<120x32xf32, #tpu.memory_space<vmem>>, vector<32x32xf32>,
    %c64_39 = arith.constant 64 : index
    %c0_40 = arith.constant 0 : index
    %66 = vector.load %arg13[%c64_39, %c0_40] : memref<120x32xf32, #tpu.memory_space<vmem>>, vector<16x32xf32>
    %c80 = arith.constant 80 : index
    %c0_41 = arith.constant 0 : index
    %67 = vector.load %arg13[%c80, %c0_41] : memref<120x32xf32, #tpu.memory_space<vmem>>, vector<16x32xf32>
    %c64_42 = arith.constant 64 : index
    %c0_43 = arith.constant 0 : index
    %68 = vector.load %arg14[%c64_42, %c0_43] : memref<120x32xf32, #tpu.memory_space<vmem>>, vector<16x32xf32>
    %c80_44 = arith.constant 80 : index
    %c0_45 = arith.constant 0 : index
    %69 = vector.load %arg14[%c80_44, %c0_45] : memref<120x32xf32, #tpu.memory_space<vmem>>, vector<16x32xf32>
    %cst_46 = arith.constant dense<0.000000e+00> : vector<16x160xf32>
    %70 = tpu.matmul %66, %33, %cst_46 {dimension_numbers = #tpu.dot_dimension_numbers<[1], [0], [0], [1], [0, 0, 1, 1], [], []>} : vector<16x32xf32>, vector<32x160xf32>, vector<16x160xf32> -> vector<16x160xf32>
    %cst_47 = arith.constant dense<0.000000e+00> : vector<16x160xf32>
    %71 = tpu.matmul %67, %34, %cst_47 {dimension_numbers = #tpu.dot_dimension_numbers<[1], [0], [0], [1], [0, 0, 1, 1], [], []>} : vector<16x32xf32>, vector<32x160xf32>, vector<16x160xf32> -> vector<16x160xf32>
    %72 = arith.addf %70, %71 : vector<16x160xf32>
    %73 = vector.broadcast %35 : vector<1x160xf32> to vector<16x160xf32>
    %74 = arith.addf %72, %73 : vector<16x160xf32>
    %75 = vector.extract_strided_slice %74 {offsets = [0, 0], sizes = [16, 128], strides = [1, 1]} : vector<16x160xf32> to vector<16x128xf32>
    %76 = arith.negf %75 : vector<16x128xf32>
    %77 = math.exp %76 : vector<16x128xf32>
    %cst_48 = arith.constant 1.000000e+00 : f32
    %78 = vector.broadcast %cst_48 : f32 to vector<16x128xf32>
    %79 = arith.addf %78, %77 : vector<16x128xf32>
    %80 = arith.divf %78, %79 : vector<16x128xf32>
    %81 = vector.extract_strided_slice %80 {offsets = [0, 0], sizes = [16, 32], strides = [1, 1]} : vector<16x128xf32> to vector<16x32xf32>
    %82 = vector.extract_strided_slice %80 {offsets = [0, 32], sizes = [16, 32], strides = [1, 1]} : vector<16x128xf32> to vector<16x32xf32>
    %83 = vector.extract_strided_slice %80 {offsets = [0, 64], sizes = [16, 32], strides = [1, 1]} : vector<16x128xf32> to vector<16x32xf32>
    %84 = vector.extract_strided_slice %80 {offsets = [0, 96], sizes = [16, 32], strides = [1, 1]} : vector<16x128xf32> to vector<16x32xf32>
    %85 = vector.extract_strided_slice %74 {offsets = [0, 128], sizes = [16, 32], strides = [1, 1]} : vector<16x160xf32> to vector<16x32xf32>
    %86 = math.tanh %85 : vector<16x32xf32>
    %87 = arith.mulf %83, %86 : vector<16x32xf32>
    %88 = arith.mulf %81, %68 : vector<16x32xf32>
    %89 = arith.addf %87, %88 : vector<16x32xf32>
    %90 = arith.mulf %82, %69 : vector<16x32xf32>
    %91 = arith.addf %89, %90 : vector<16x32xf32>
    %92 = math.tanh %91 : vector<16x32xf32>
    %93 = arith.mulf %84, %92 : vector<16x32xf32>
    %c96 = arith.constant 96 : index
    %c0_49 = arith.constant 0 : index
    %94 = vector.load %arg13[%c96, %c0_49] : memref<120x32xf32, #tpu.memory_space<vmem>>, vector<16x32xf32>
    tpu.vector_store %arg13[%c96, %c0_49], %93 {strides = array<i32>} : memref<120x32xf32, #tpu.memory_space<vmem>>, vector<16x32xf32>,
    %c96_50 = arith.constant 96 : index
    %c0_51 = arith.constant 0 : index
    %95 = vector.load %arg14[%c96_50, %c0_51] : memref<120x32xf32, #tpu.memory_space<vmem>>, vector<16x32xf32>
    tpu.vector_store %arg14[%c96_50, %c0_51], %91 {strides = array<i32>} : memref<120x32xf32, #tpu.memory_space<vmem>>, vector<16x32xf32>,
    %c96_52 = arith.constant 96 : index
    %c0_53 = arith.constant 0 : index
    %96 = vector.load %arg13[%c96_52, %c0_53] : memref<120x32xf32, #tpu.memory_space<vmem>>, vector<8x32xf32>
    %c104 = arith.constant 104 : index
    %c0_54 = arith.constant 0 : index
    %97 = vector.load %arg13[%c104, %c0_54] : memref<120x32xf32, #tpu.memory_space<vmem>>, vector<8x32xf32>
    %c96_55 = arith.constant 96 : index
    %c0_56 = arith.constant 0 : index
    %98 = vector.load %arg14[%c96_55, %c0_56] : memref<120x32xf32, #tpu.memory_space<vmem>>, vector<8x32xf32>
    %c104_57 = arith.constant 104 : index
    %c0_58 = arith.constant 0 : index
    %99 = vector.load %arg14[%c104_57, %c0_58] : memref<120x32xf32, #tpu.memory_space<vmem>>, vector<8x32xf32>
    %cst_59 = arith.constant dense<0.000000e+00> : vector<8x160xf32>
    %100 = tpu.matmul %96, %33, %cst_59 {dimension_numbers = #tpu.dot_dimension_numbers<[1], [0], [0], [1], [0, 0, 1, 1], [], []>} : vector<8x32xf32>, vector<32x160xf32>, vector<8x160xf32> -> vector<8x160xf32>
    %cst_60 = arith.constant dense<0.000000e+00> : vector<8x160xf32>
    %101 = tpu.matmul %97, %34, %cst_60 {dimension_numbers = #tpu.dot_dimension_numbers<[1], [0], [0], [1], [0, 0, 1, 1], [], []>} : vector<8x32xf32>, vector<32x160xf32>, vector<8x160xf32> -> vector<8x160xf32>
    %102 = arith.addf %100, %101 : vector<8x160xf32>
    %103 = vector.broadcast %35 : vector<1x160xf32> to vector<8x160xf32>
    %104 = arith.addf %102, %103 : vector<8x160xf32>
    %105 = vector.extract_strided_slice %104 {offsets = [0, 0], sizes = [8, 128], strides = [1, 1]} : vector<8x160xf32> to vector<8x128xf32>
    %106 = arith.negf %105 : vector<8x128xf32>
    %107 = math.exp %106 : vector<8x128xf32>
    %cst_61 = arith.constant 1.000000e+00 : f32
    %108 = vector.broadcast %cst_61 : f32 to vector<8x128xf32>
    %109 = arith.addf %108, %107 : vector<8x128xf32>
    %110 = arith.divf %108, %109 : vector<8x128xf32>
    %111 = vector.extract_strided_slice %110 {offsets = [0, 0], sizes = [8, 32], strides = [1, 1]} : vector<8x128xf32> to vector<8x32xf32>
    %112 = vector.extract_strided_slice %110 {offsets = [0, 32], sizes = [8, 32], strides = [1, 1]} : vector<8x128xf32> to vector<8x32xf32>
    %113 = vector.extract_strided_slice %110 {offsets = [0, 64], sizes = [8, 32], strides = [1, 1]} : vector<8x128xf32> to vector<8x32xf32>
    %114 = vector.extract_strided_slice %110 {offsets = [0, 96], sizes = [8, 32], strides = [1, 1]} : vector<8x128xf32> to vector<8x32xf32>
    %115 = vector.extract_strided_slice %104 {offsets = [0, 128], sizes = [8, 32], strides = [1, 1]} : vector<8x160xf32> to vector<8x32xf32>
    %116 = math.tanh %115 : vector<8x32xf32>
    %117 = arith.mulf %113, %116 : vector<8x32xf32>
    %118 = arith.mulf %111, %98 : vector<8x32xf32>
    %119 = arith.addf %117, %118 : vector<8x32xf32>
    %120 = arith.mulf %112, %99 : vector<8x32xf32>
    %121 = arith.addf %119, %120 : vector<8x32xf32>
    %122 = math.tanh %121 : vector<8x32xf32>
    %123 = arith.mulf %114, %122 : vector<8x32xf32>
    %c112 = arith.constant 112 : index
    %c0_62 = arith.constant 0 : index
    %124 = vector.load %arg13[%c112, %c0_62] : memref<120x32xf32, #tpu.memory_space<vmem>>, vector<8x32xf32>
    tpu.vector_store %arg13[%c112, %c0_62], %123 {strides = array<i32>} : memref<120x32xf32, #tpu.memory_space<vmem>>, vector<8x32xf32>,
    %c112_63 = arith.constant 112 : index
    %c0_64 = arith.constant 0 : index
    %125 = vector.load %arg14[%c112_63, %c0_64] : memref<120x32xf32, #tpu.memory_space<vmem>>, vector<8x32xf32>
    tpu.vector_store %arg14[%c112_63, %c0_64], %121 {strides = array<i32>} : memref<120x32xf32, #tpu.memory_space<vmem>>, vector<8x32xf32>,
    %c0_65 = arith.constant 0 : index
    %c0_66 = arith.constant 0 : index
    %126 = vector.load %arg13[%c0_65, %c0_66] : memref<120x32xf32, #tpu.memory_space<vmem>>, vector<120x32xf32>
    %c0_67 = arith.constant 0 : index
    %c0_68 = arith.constant 0 : index
    %127 = vector.load %arg10[%c0_67, %c0_68] : memref<32x128xf32, #tpu.memory_space<vmem>>, vector<32x128xf32>
    %cst_69 = arith.constant dense<0.000000e+00> : vector<120x128xf32>
    %128 = tpu.matmul %126, %127, %cst_69 {dimension_numbers = #tpu.dot_dimension_numbers<[1], [0], [0], [1], [0, 0, 1, 1], [], []>} : vector<120x32xf32>, vector<32x128xf32>, vector<120x128xf32> -> vector<120x128xf32>
    %c0_70 = arith.constant 0 : index
    %c0_71 = arith.constant 0 : index
    %129 = vector.load %arg11[%c0_70, %c0_71] : memref<1x128xf32, #tpu.memory_space<vmem>>, vector<1x128xf32>
    %130 = vector.broadcast %129 : vector<1x128xf32> to vector<120x128xf32>
    %131 = arith.addf %128, %130 : vector<120x128xf32>
    %c0_72 = arith.constant 0 : index
    %c0_73 = arith.constant 0 : index
    %132 = vector.load %arg12[%c0_72, %c0_73] : memref<120x128xf32, #tpu.memory_space<vmem>>, vector<120x128xf32>
    tpu.vector_store %arg12[%c0_72, %c0_73], %131 {strides = array<i32>} : memref<120x128xf32, #tpu.memory_space<vmem>>, vector<120x128xf32>,
    return
  }
  func.func @transform_0(%arg0: i32) -> (i32, i32) {
    %c0_i32 = arith.constant 0 : i32
    %c0_i32_0 = arith.constant 0 : i32
    return %arg0, %c0_i32 : i32, i32
  }
  func.func @transform_1(%arg0: i32) -> (i32, i32) {
    %c0_i32 = arith.constant 0 : i32
    %c0_i32_0 = arith.constant 0 : i32
    return %arg0, %c0_i32 : i32, i32
  }
  func.func @transform_2(%arg0: i32) -> (i32, i32) {
    %c0_i32 = arith.constant 0 : i32
    %c0_i32_0 = arith.constant 0 : i32
    return %arg0, %c0_i32 : i32, i32
  }
  func.func @transform_3(%arg0: i32) -> (i32, i32) {
    %c0_i32 = arith.constant 0 : i32
    %c0_i32_0 = arith.constant 0 : i32
    %c0_i32_1 = arith.constant 0 : i32
    return %c0_i32, %c0_i32_0 : i32, i32
  }
  func.func @transform_4(%arg0: i32) -> (i32, i32) {
    %c0_i32 = arith.constant 0 : i32
    %c0_i32_0 = arith.constant 0 : i32
    %c0_i32_1 = arith.constant 0 : i32
    return %c0_i32, %c0_i32_0 : i32, i32
  }
  func.func @transform_5(%arg0: i32) -> (i32, i32) {
    %c0_i32 = arith.constant 0 : i32
    %c0_i32_0 = arith.constant 0 : i32
    %c0_i32_1 = arith.constant 0 : i32
    return %c0_i32, %c0_i32_0 : i32, i32
  }
  func.func @transform_6(%arg0: i32) -> (i32, i32) {
    %c0_i32 = arith.constant 0 : i32
    %c0_i32_0 = arith.constant 0 : i32
    %c0_i32_1 = arith.constant 0 : i32
    return %c0_i32, %c0_i32_0 : i32, i32
  }
  func.func @transform_7(%arg0: i32) -> (i32, i32) {
    %c0_i32 = arith.constant 0 : i32
    %c0_i32_0 = arith.constant 0 : i32
    %c0_i32_1 = arith.constant 0 : i32
    return %c0_i32, %c0_i32_0 : i32, i32
  }
  func.func @transform_8(%arg0: i32) -> (i32, i32) {
    %c0_i32 = arith.constant 0 : i32
    %c0_i32_0 = arith.constant 0 : i32
    %c0_i32_1 = arith.constant 0 : i32
    return %c0_i32, %c0_i32_0 : i32, i32
  }
  func.func @transform_9(%arg0: i32) -> (i32, i32) {
    %c0_i32 = arith.constant 0 : i32
    %c0_i32_0 = arith.constant 0 : i32
    %c0_i32_1 = arith.constant 0 : i32
    return %c0_i32, %c0_i32_0 : i32, i32
  }
  func.func @transform_10(%arg0: i32) -> (i32, i32) {
    %c0_i32 = arith.constant 0 : i32
    %c0_i32_0 = arith.constant 0 : i32
    %c0_i32_1 = arith.constant 0 : i32
    return %c0_i32, %c0_i32_0 : i32, i32
  }
  func.func @transform_11(%arg0: i32) -> (i32, i32) {
    %c0_i32 = arith.constant 0 : i32
    %c0_i32_0 = arith.constant 0 : i32
    return %arg0, %c0_i32 : i32, i32
  }
}

</mosaic_0001>

<bundles_post_ra>
// kernel: tpu_custom_call.1
= control target key start
LH: loop header
LB: loop body
LE: loop exit
PB: predicated region body
PF: predicated region fallthrough
CT: control target
= control target key end

     0   :  { %16 = vsyncpa [#allocation5], 0  ;;  %s3404_s0 = inlined_call_operand.vmem [shape: f32[128,32], index: 0, kind: input, shape index: {}]   ;;  %s3405_s1 = inlined_call_operand.vmem [shape: f32[128,1], index: 1, kind: input, shape index: {}]   ;;  %s3406_s2 = inlined_call_operand.vmem [shape: f32[128,32], index: 2, kind: input, shape index: {}]   ;;  %s3407_s3 = inlined_call_operand.vmem [shape: f32[32,32], index: 3, kind: input, shape index: {}]   ;;  %s3408_s4 = inlined_call_operand.vmem [shape: f32[1,32], index: 4, kind: input, shape index: {}]   ;;  %s3409_s5 = inlined_call_operand.vmem [shape: f32[32,96], index: 5, kind: input, shape index: {}]   ;;  %s3410_s6 = inlined_call_operand.vmem [shape: f32[1,96], index: 6, kind: input, shape index: {}]   ;;  %s3411_s7 = inlined_call_operand.vmem [shape: f32[64,160], index: 7, kind: input, shape index: {}]   ;;  %s3412_s8 = inlined_call_operand.vmem [shape: f32[1,160], index: 8, kind: input, shape index: {}]   ;;  %s3413_s9 = inlined_call_operand.vmem [shape: f32[32,128], index: 9, kind: input, shape index: {}]   ;;  %s3414_s10 = inlined_call_operand.vmem [shape: f32[1,128], index: 10, kind: input, shape index: {}]   ;;  %s3415_s11 = inlined_call_operand.hbm [shape: f32[240,128], index: 11, kind: output, shape index: {}]  }
   0x1   :  { %18 = vsyncpa [#allocation5 + $0x1], 0  ;;  %s2827_s17 = smov 0   ;;  %s2829_s18 = smov 0  }
   0x2   :  { %s2831_s19 = smov 0   ;;  %s2833_s20 = smov 0  }
   0x3 LB: > { %s2848_s21 = sadd.s32 4294967295, %s2755_s20   ;;  %s2221_s22 = sadd.s32 4294967294, %s2755_s20   ;;  %s2755_s20 = sphi %s2833_s20, %s3423_s20   ;;  %s2751_s19 = sphi %s2831_s19, %s3422_s19   ;;  %s2747_s18 = sphi %s2829_s18, %s3421_s18   ;;  %s2743_s17 = sphi %s2827_s17, %s3420_s17  }
   0x4   : > { %s2852_s23 = sadd.s32 1, %s2755_s20   ;;  %s277_s24 = sadd.s32 1, %s2751_s19 }
   0x5   : > { %s274_s25 = ssub.s32 %s2755_s20, %s2852_s23  ;;  %p287_p0 = scmp.ne.s32.totalorder %s2751_s19, %s2747_s18 }
   0x6   : > { %p275_p1 = scmp.eq.s32.totalorder %s274_s25, 0  ;;  %p288_p2 = scmp.eq.s32.totalorder %s2848_s21, 1 }
   0x7   : > { %p293_p3 = scmp.ne.s32.totalorder %s2747_s18, %s2743_s17  ;;  %p294_p4 = scmp.eq.s32.totalorder %s2221_s22, 1 }
   0x8   : > { %s2863_s26 = scalar_select %p275_p1, %s2751_s19, %s277_s24  }
   0x9   : > { %p2865_p5 = por %p288_p2, %p287_p0  ;;  %p2869_p6 = por %p294_p4, %p293_p3 }
   0xa   : > { %3416 = sst [smem:[#allocation7_spill]] %s2863_s26  ;;  %p2224_p7 = scmp.ge.s32.totalorder %s2755_s20, 1 }
   0xb   : > { %p363_p8 = scmp.lt.s32.totalorder %s2755_s20, 3 }
   0xd   : > { %p364_p9 = pnand %p2224_p7, %p363_p8 }
   0xe   : > { %v440_v0 = vld [vmem:[%s3407_s3] sm:$0xff] (!%p364_p9)  ;;  %v441_v1 = vld [vmem:[%s3407_s3 + $0x8] sm:$0xff] (!%p364_p9)  ;;  %v442_v2 = vld [vmem:[%s3407_s3 + $0x10] sm:$0xff] (!%p364_p9)  ;;  %s2225_s16 = sshll.u32 (!%p364_p9), %s2848_s21, 3  ;;  %vm451_vm0 = vcmask (!%p364_p9), 261120   ;;  %v2757_v20 = vmov (!%p364_p9), 0  }
   0xf   : > { %367 = sbr.rel (%p364_p9) target bundleno = 2964 (0xb94), region = 64  ;;  %v2434_v3 = vpack.c.bf16 (!%p364_p9), %v441_v1, %v440_v0  ;;  %v443_v4 = vld [vmem:[%s3407_s3 + $0x18] sm:$0xff] (!%p364_p9)  ;;  %p414_p10 = scmp.lt.s32.totalorder (!%p364_p9), %s2225_s16, 15  ;;  %v589_v5 = vld [vmem:[%s3409_s5] sm:$0xff] (!%p364_p9)  ;;  %v590_v6 = vld [vmem:[%s3409_s5 + $0x8] sm:$0xff] (!%p364_p9)  ;;  %2572 = vset.pattern.permute.xlu1 (!%p364_p9), %v2757_v20  ;;  %2571 = vset.pattern.permute.xlu0 (!%p364_p9), %v2757_v20  ;;  %vm2763_vm1 = vmmov (!%p364_p9), 0  }
  0x10   : > { %v2438_v7 = vpack.c.bf16 (!%p364_p9), %v443_v4, %v442_v2  ;;  %v2442_v8 = vpack.c.bf16 (!%p364_p9), %v590_v6, %v589_v5  ;;  %v591_v17 = vld [vmem:[%s3409_s5 + $0x10] sm:$0xff] (!%p364_p9)  ;;  %v592_v18 = vld [vmem:[%s3409_s5 + $0x18] sm:$0xff] (!%p364_p9)  ;;  %v2231_v29 = vld [vmem:[%s3408_s4] ss:$0 sm:$0xff] (!%p364_p9)  ;;  %s2761_s13 = smov (!%p364_p9), 96   ;;  %s410_s24 = sand.u32 (!%p364_p9), 1, %s2747_s18  }
  0x11   : > { %2435 = vmatprep.subr.bf16.mxu0 (!%p364_p9), %v2434_v3  ;;  %v2446_v19 = vpack.c.bf16 (!%p364_p9), %v592_v18, %v591_v17  ;;  %s2297_s14 = smul.u32 (!%p364_p9), 1920, %s2848_s21 }
  0x12   : > { %2437 = vmatpush3.bf16.msra.mxu0 (!%p364_p9), %v2434_v3  ;;  %2443 = vmatprep.subr.bf16.mxu1 (!%p364_p9), %v2442_v8  ;;  %v2248_v3 = vld [vmem:[%s3410_s6] ss:$0 sm:$0xff] (!%p364_p9) }
  0x13   : > { %2439 = vmatprep.subr.bf16.mxu0 (!%p364_p9), %v2438_v7  ;;  %2445 = vmatpush3.bf16.msra.mxu1 (!%p364_p9), %v2442_v8 }
  0x14   : > { %2447 = vmatprep.subr.bf16.mxu1 (!%p364_p9), %v2446_v19 }
  0x16   : > { %s3425_s16 = smov (!%p414_p10, %s2225_s16), 15  ;;  %2441 = vmatpush3.bf16.msra.mxu0 %v2438_v7 }
  0x17   : > { %s2894_s12 = sshll.u32 %s3425_s16, 3  ;;  %2449 = vmatpush3.bf16.msra.mxu1 %v2446_v19  ;;  %s2758_s16 = smov 64  }
  0x18   : > { %s417_s26 = scalar_lea.vmem %s3404_s0, %s2894_s12  ;;  %s423_s30 = scalar_lea.vmem %s3405_s1, %s2894_s12 }
  0x19   : > { %v432_v9 = vld [vmem:[%s417_s26] sm:$0xff]  ;;  %v433_v10 = vld [vmem:[%s417_s26 + $0x8] sm:$0xff]  ;;  %v434_v11 = vld [vmem:[%s417_s26 + $0x10] sm:$0xff]  ;;  %s2944_s25 = scalar_lea.vmem %s3406_s2, %s2894_s12  ;;  %s2759_s12 = smov 32  }
  0x1a   : > { %2349 = vmatprep.mubr.msk.f32.mxu0 %vm451_vm0, %v432_v9  ;;  %v435_v12 = vld [vmem:[%s417_s26 + $0x18] sm:$0xff]  ;;  %v436_v13 = vld [vmem:[%s417_s26 + $0x20] sm:$0xff]  ;;  %v437_v14 = vld [vmem:[%s417_s26 + $0x28] sm:$0xff] }
  0x1b   : > { %2350 = vmatmul.mubr.msk.f32.vlgmr.msra.gmra.mrb[0].mxu0 %vm451_vm0, %v433_v10  ;;  %v438_v15 = vld [vmem:[%s417_s26 + $0x30] sm:$0xff]  ;;  %v439_v16 = vld [vmem:[%s417_s26 + $0x38] sm:$0xff]  ;;  %v726_v22 = vld [vmem:[%s423_s30 + $0x20] sm:$0xff] }
  0x1c   : > { %2352 = vmatprep.mubr.msk.f32.mxu0 %vm451_vm0, %v434_v11  ;;  %v728_v21 = vld [vmem:[%s423_s30 + $0x30] sm:$0xff]  ;;  %752 = vperm.xlu0 %2571, %v726_v22   ;;  %v729_v23 = vld [vmem:[%s423_s30 + $0x38] sm:$0xff]  ;;  %v727_v24 = vld [vmem:[%s423_s30 + $0x28] sm:$0xff] }
  0x1d   : > { %762 = vperm.xlu1 %2572, %v728_v21   ;;  %v723_v25 = vld [vmem:[%s423_s30 + $0x8] sm:$0xff]  ;;  %v722_v26 = vld [vmem:[%s423_s30] sm:$0xff]  ;;  %v725_v27 = vld [vmem:[%s423_s30 + $0x18] sm:$0xff] }
  0x1e   : > { %v724_v28 = vld [vmem:[%s423_s30 + $0x10] sm:$0xff] }
  0x1f   : > { %2353 = vmatmul.mubr.msk.f32.gmra.mrb[2].mxu0 %vm451_vm0, %v435_v12 }
  0x20   : > { %2355 = vmatprep.mubr.msk.f32.mxu0 %vm451_vm0, %v436_v13  ;;  %757 = vperm.xlu0 %2571, %v727_v24  }
  0x21   : > { %767 = vperm.xlu1 %2572, %v729_v23  }
  0x23   : > { %2356 = vmatmul.mubr.msk.f32.gmra.mrb[4].mxu0 %vm451_vm0, %v437_v14 }
  0x24   : > { %2358 = vmatprep.mubr.msk.f32.mxu0 %vm451_vm0, %v438_v15  ;;  %732 = vperm.xlu0 %2571, %v722_v26  }
  0x25   : > { %737 = vperm.xlu1 %2572, %v723_v25  }
  0x27   : > { %2359 = vmatmul.mubr.msk.f32.gmra.mrb[6].mxu0 %vm451_vm0, %v439_v16 }
  0x28   : > { %742 = vperm.xlu0 %2571, %v724_v28  }
  0x29   : > { %747 = vperm.xlu1 %2572, %v725_v27  }
  0x9b   : > { %v753_v55 = vpop.permute.xlu0 %752 }
  0x9c   : > { %v763_v54 = vpop.permute.xlu1 %762 }
  0x9f   : > { %v758_v59 = vpop.permute.xlu0 %757 }
  0xa0   : > { %v768_v58 = vpop.permute.xlu1 %767 }
  0xa3   : > { %v733_v0 = vpop.permute.xlu0 %732 }
  0xa4   : > { %v738_v62 = vpop.permute.xlu1 %737 }
  0xa7   : > { %v743_v14 = vpop.permute.xlu0 %742 }
  0xa8   : > { %v748_v12 = vpop.permute.xlu1 %747 }
  0xee   : > { %v2351_v30 = vpop.f32.mrb[0].mxu0 }
  0xef   : > { %v548_v31 = vadd.f32 %v2351_v30, %v2231_v29  ;;  %v542_v32 = vpop.f32.mrb[1].mxu0 }
  0xf0   : > { %v543_v33 = vadd.f32 %v2231_v29, %v542_v32 }
  0xf1   : > { %v582_v36 = vmax.f32 %v548_v31, 0.0 }
  0xf2   : > { %v581_v34 = vmax.f32 %v543_v33, 0.0  ;;  %v2354_v35 = vpop.f32.mrb[2].mxu0 }
  0xf3   : > { %v558_v37 = vadd.f32 %v2354_v35, %v2231_v29  ;;  %v552_v38 = vpop.f32.mrb[3].mxu0 }
  0xf4   : > { %v553_v39 = vadd.f32 %v2231_v29, %v552_v38  ;;  %2369 = vmatprep.mubr.msk.f32.mxu1 %vm451_vm0, %v581_v34 }
  0xf5   : > { %2370 = vmatmul.mubr.msk.f32.vlgmr.msra.gmra.mrb[0].mxu1 %vm451_vm0, %v582_v36  ;;  %v584_v42 = vmax.f32 %v558_v37, 0.0 }
  0xf6   : > { %v583_v40 = vmax.f32 %v553_v39, 0.0  ;;  %v2357_v41 = vpop.f32.mrb[4].mxu0 }
  0xf7   : > { %v568_v43 = vadd.f32 %v2357_v41, %v2231_v29  ;;  %v562_v44 = vpop.f32.mrb[5].mxu0 }
  0xf8   : > { %v563_v45 = vadd.f32 %v2231_v29, %v562_v44  ;;  %2372 = vmatprep.mubr.msk.f32.mxu1 %vm451_vm0, %v583_v40 }
  0xf9   : > { %2373 = vmatmul.mubr.msk.f32.gmra.mrb[2].mxu1 %vm451_vm0, %v584_v42  ;;  %v586_v48 = vmax.f32 %v568_v43, 0.0 }
  0xfa   : > { %v585_v46 = vmax.f32 %v563_v45, 0.0  ;;  %v2360_v47 = vpop.f32.mrb[6].mxu0 }
  0xfb   : > { %v578_v49 = vadd.f32 %v2360_v47, %v2231_v29  ;;  %v572_v50 = vpop.f32.mrb[7].mxu0 }
  0xfc   : > { %v573_v51 = vadd.f32 %v2231_v29, %v572_v50  ;;  %2375 = vmatprep.mubr.msk.f32.mxu1 %vm451_vm0, %v585_v46 }
  0xfd   : > { %v588_v52 = vmax.f32 %v578_v49, 0.0  ;;  %2376 = vmatmul.mubr.msk.f32.gmra.mrb[4].mxu1 %vm451_vm0, %v586_v48 }
  0xfe   : > { %v587_v53 = vmax.f32 %v573_v51, 0.0 }
 0x100   : > { %2378 = vmatprep.mubr.msk.f32.mxu1 %vm451_vm0, %v587_v53 }
 0x101   : > { %2379 = vmatmul.mubr.msk.f32.gmra.mrb[6].mxu1 %vm451_vm0, %v588_v52 }
 0x1c8   : > { %v2371_v56 = vpop.f32.mrb[0].mxu1 }
 0x1c9   : > { %v683_v57 = vpop.f32.mrb[1].mxu1  ;;  %v771_v8 = vmul.f32 %v2371_v56, %v738_v62  ;;  %v894_v56 = vld [vmem:[%s2944_s25 + $0x28] sm:$0xff] }
 0x1ca   : > { %v770_v11 = vmul.f32 %v733_v0, %v683_v57 }
 0x1cb   : > { %v786_v17 = vadd.f32 %v2248_v3, %v771_v8 }
 0x1cc   : > { %v2374_v60 = vpop.f32.mrb[2].mxu1  ;;  %v785_v19 = vadd.f32 %v2248_v3, %v770_v11 }
 0x1cd   : > { %v693_v61 = vpop.f32.mrb[3].mxu1  ;;  %v773_v18 = vmul.f32 %v2374_v60, %v748_v12  ;;  %v2250_v35 = vmul.f32 -1.442695, %v786_v17  ;;  %v893_v60 = vld [vmem:[%s2944_s25 + $0x20] sm:$0xff]  ;;  %v890_v12 = vld [vmem:[%s2944_s25 + $0x8] sm:$0xff] }
 0x1ce   : > { %v772_v20 = vmul.f32 %v743_v14, %v693_v61  ;;  %v2249_v36 = vmul.f32 -1.442695, %v785_v19 }
 0x1cf   : > { %v788_v21 = vadd.f32 %v2248_v3, %v773_v18 }
 0x1d0   : > { %v2377_v63 = vpop.f32.mrb[4].mxu1  ;;  %v787_v22 = vadd.f32 %v2248_v3, %v772_v20 }
 0x1d1   : > { %v775_v1 = vmul.f32 %v2377_v63, %v758_v59  ;;  %v703_v2 = vpop.f32.mrb[5].mxu1  ;;  %v2252_v37 = vmul.f32 -1.442695, %v788_v21 }
 0x1d2   : > { %v774_v4 = vmul.f32 %v753_v55, %v703_v2  ;;  %v2251_v38 = vmul.f32 -1.442695, %v787_v22  ;;  %v896_v2 = vld [vmem:[%s2944_s25 + $0x38] sm:$0xff] }
 0x1d3   : > { %v790_v5 = vadd.f32 %v2248_v3, %v775_v1 }
 0x1d4   : > { %v789_v6 = vadd.f32 %v2248_v3, %v774_v4  ;;  %v2380_v7 = vpop.f32.mrb[6].mxu1 }
 0x1d5   : > { %2573 = vtanh.f32 %v790_v5  ;;  %v777_v9 = vmul.f32 %v2380_v7, %v768_v58  ;;  %v713_v10 = vpop.f32.mrb[7].mxu1  ;;  %v2254_v31 = vmul.f32 -1.442695, %v790_v5 }
 0x1d6   : > { %2575 = vtanh.f32 %v789_v6  ;;  %v776_v13 = vmul.f32 %v763_v54, %v713_v10  ;;  %v2253_v32 = vmul.f32 -1.442695, %v789_v6  ;;  %v895_v6 = vld [vmem:[%s2944_s25 + $0x30] sm:$0xff] }
 0x1d7   : > { %v792_v15 = vadd.f32 %v2248_v3, %v777_v9 }
 0x1d8   : > { %v791_v16 = vadd.f32 %v2248_v3, %v776_v13 }
 0x1d9   : > { %2577 = vtanh.f32 %v792_v15  ;;  %v2256_v33 = vmul.f32 -1.442695, %v792_v15 }
 0x1da   : > { %2579 = vtanh.f32 %v791_v16  ;;  %v2255_v34 = vmul.f32 -1.442695, %v791_v16  ;;  %v889_v16 = vld [vmem:[%s2944_s25] sm:$0xff] }
 0x1db   : > { %2581 = vtanh.f32 %v786_v17 }
 0x1dc   : > { %2583 = vtanh.f32 %v785_v19 }
 0x1dd   : > { %2585 = vtanh.f32 %v788_v21 }
 0x1de   : > { %2587 = vtanh.f32 %v787_v22  ;;  %v892_v22 = vld [vmem:[%s2944_s25 + $0x18] sm:$0xff] }
 0x1df   : > { %v2574_v23 = vpop.eup %2573  ;;  %2589 = vpow2.f32 %v2254_v31 }
 0x1e0   : > { %v2576_v24 = vpop.eup %2575  ;;  %867 = vrot.lane.b32.xlu1 %v2574_v23, %s2758_s16  ;;  %2591 = vpow2.f32 %v2253_v32 }
 0x1e1   : > { %865 = vrot.lane.b32.xlu0 %v2576_v24, %s2758_s16  ;;  %2593 = vpow2.f32 %v2256_v33 }
 0x1e2   : > { %2595 = vpow2.f32 %v2255_v34 }
 0x1e3   : > { %v2578_v25 = vpop.eup %2577  ;;  %2597 = vpow2.f32 %v2250_v35 }
 0x1e4   : > { %v2580_v26 = vpop.eup %2579  ;;  %871 = vrot.lane.b32.xlu1 %v2578_v25, %s2758_s16  ;;  %2599 = vpow2.f32 %v2249_v36 }
 0x1e5   : > { %869 = vrot.lane.b32.xlu0 %v2580_v26, %s2758_s16  ;;  %v2582_v27 = vpop.eup %2581  ;;  %2601 = vpow2.f32 %v2252_v37  ;;  %v891_v26 = vld [vmem:[%s2944_s25 + $0x10] sm:$0xff]  ;;  %v1010_v37 = vld [vmem:[%s3411_s7 + $0x48] sm:$0xff]  ;;  %s2522_s25 = smul.u32 120, %s410_s24 }
 0x1e6   : > { %v2584_v28 = vpop.eup %2583  ;;  %2603 = vpow2.f32 %v2251_v38  ;;  %v1012_v38 = vld [vmem:[%s3411_s7 + $0x58] sm:$0xff] }
 0x1e7   : > { %v2586_v29 = vpop.eup %2585 }
 0x1e8   : > { %859 = vrot.lane.b32.xlu1 %v2582_v27, %s2758_s16  ;;  %v2588_v30 = vpop.eup %2587 }
 0x1e9   : > { %857 = vrot.lane.b32.xlu0 %v2584_v28, %s2758_s16  ;;  %v2590_v39 = vpop.eup %2589 }
 0x1ea   : > { %v2592_v40 = vpop.eup %2591  ;;  %v822_v41 = vadd.f32 1.0, %v2590_v39  ;;  %v1009_v39 = vld [vmem:[%s3411_s7 + $0x40] sm:$0xff] }
 0x1eb   : > { %v2594_v42 = vpop.eup %2593  ;;  %v821_v43 = vadd.f32 1.0, %v2592_v40 }
 0x1ec   : > { %863 = vrot.lane.b32.xlu1 %v2586_v29, %s2758_s16  ;;  %v2596_v44 = vpop.eup %2595  ;;  %2605 = vrcp.f32 %v822_v41  ;;  %v824_v45 = vadd.f32 1.0, %v2594_v42  ;;  %v3001_v41 = vpack.c.bf16 %v1012_v38, %v1010_v37  ;;  %v1011_v42 = vld [vmem:[%s3411_s7 + $0x50] sm:$0xff]  ;;  %v1913_v37 = vld [vmem:[%s3413_s9 + $0x18] sm:$0xff] }
 0x1ed   : > { %861 = vrot.lane.b32.xlu0 %v2588_v30, %s2758_s16  ;;  %v2598_v46 = vpop.eup %2597  ;;  %2607 = vrcp.f32 %v821_v43  ;;  %v823_v47 = vadd.f32 1.0, %v2596_v44  ;;  %v3007_v44 = vpack.c.bf16 %v1011_v42, %v1009_v39 }
 0x1ee   : > { %v2600_v48 = vpop.eup %2599  ;;  %v818_v49 = vadd.f32 1.0, %v2598_v46  ;;  %2609 = vrcp.f32 %v824_v45  ;;  %2451 = vmatprep.subr.bf16.mxu0 %v3001_v41  ;;  %2467 = vmatprep.subr.bf16.mxu1 %v3001_v41  ;;  %v1014_v45 = vld [vmem:[%s3411_s7 + $0x68] sm:$0xff]  ;;  %v1016_v46 = vld [vmem:[%s3411_s7 + $0x78] sm:$0xff] }
 0x1ef   : > { %v2602_v50 = vpop.eup %2601  ;;  %v817_v51 = vadd.f32 1.0, %v2600_v48  ;;  %2611 = vrcp.f32 %v823_v47  ;;  %2453 = vmatpush1.bf16.msra.mxu0 %v3007_v44  ;;  %2469 = vmatpush1.bf16.msra.mxu1 %v3007_v44  ;;  %v3020_v47 = vpack.c.bf16 %v1016_v46, %v1014_v45  ;;  %v1013_v48 = vld [vmem:[%s3411_s7 + $0x60] sm:$0xff]  ;;  %v1237_v45 = vlaneseq }
 0x1f0   : > { %v2604_v52 = vpop.eup %2603  ;;  %2613 = vrcp.f32 %v818_v49  ;;  %v820_v53 = vadd.f32 1.0, %v2602_v50  ;;  %v1015_v49 = vld [vmem:[%s3411_s7 + $0x70] sm:$0xff] }
 0x1f1   : > { %2615 = vrcp.f32 %v817_v51  ;;  %v819_v54 = vadd.f32 1.0, %v2604_v52  ;;  %v3028_v50 = vpack.c.bf16 %v1015_v49, %v1013_v48  ;;  %2455 = vmatprep.subr.bf16.mxu0 %v3020_v47  ;;  %2471 = vmatprep.subr.bf16.mxu1 %v3020_v47  ;;  %v1002_v51 = vld [vmem:[%s3411_s7 + $0x8] sm:$0xff]  ;;  %v1004_v52 = vld [vmem:[%s3411_s7 + $0x18] sm:$0xff]  ;;  %v1238_v46 = vshrl.u32 %v1237_v45, 7  ;;  %v1017_v49 = vld [vmem:[%s3412_s8] sm:$0x3] }
 0x1f2   : > { %2617 = vrcp.f32 %v820_v53  ;;  %v2760_v53 = vmov 0.0  }
 0x1f3   : > { %2619 = vrcp.f32 %v819_v54  ;;  %2457 = vmatpush1.bf16.msra.mxu0 %v3028_v50  ;;  %2473 = vmatpush1.bf16.msra.mxu1 %v3028_v50  ;;  %v3041_v54 = vpack.c.bf16 %v1004_v52, %v1002_v51  ;;  %v1243_v48 = vsub.s32 1, %v1238_v46  ;;  %v1239_v52 = vsub.s32 0, %v1238_v46 }
 0x1f4   : > { %1110 = vmatprep.mubr.f32.mxu0 %v2760_v53  ;;  %1509 = vmatprep.mubr.f32.mxu1 %v2760_v53 }
 0x1f5   : > { %2459 = vmatprep.subr.bf16.mxu0 %v3041_v54  ;;  %2475 = vmatprep.subr.bf16.mxu1 %v3041_v54  ;;  %v3155_v51 = vrot.slane %v1017_v49, %v1243_v48 }
 0x1f6   : > { %v2946_v55 = vpop.eup %2605 }
 0x1f7   : > { %v2949_v58 = vpop.eup %2607 }
 0x1f8   : > { %v2954_v0 = vpop.eup %2609 }
 0x1f9   : > { %v2957_v4 = vpop.eup %2611 }
 0x1fa   : > { %v2964_v10 = vpop.eup %2613 }
 0x1fb   : > { %v2967_v14 = vpop.eup %2615 }
 0x1fc   : > { %v2974_v20 = vpop.eup %2617 }
 0x1fd   : > { %v2977_v24 = vpop.eup %2619 }
 0x252   : > { %v868_v57 = vpop.permute.xlu1 %867 }
 0x253   : > { %v886_v59 = vmul.f32 %v2946_v55, %v868_v57  ;;  %v866_v61 = vpop.permute.xlu0 %865 }
 0x254   : > { %v885_v62 = vmul.f32 %v2949_v58, %v866_v61 }
 0x255   : > { %v902_v63 = vadd.f32 %v894_v56, %v886_v59 }
 0x256   : > { %v901_v1 = vadd.f32 %v893_v60, %v885_v62  ;;  %v872_v3 = vpop.permute.xlu1 %871 }
 0x257   : > { %2621 = vtanh.f32 %v902_v63  ;;  %998 = vst.msk [vmem:[#allocation3 + $0x28] sm:$0xff] %vm451_vm0, %v902_v63  ;;  %v888_v5 = vmul.f32 %v2954_v0, %v872_v3  ;;  %v870_v7 = vpop.permute.xlu0 %869 }
 0x258   : > { %2623 = vtanh.f32 %v901_v1  ;;  %997 = vst.msk [vmem:[#allocation3 + $0x20] sm:$0xff] %vm451_vm0, %v901_v1  ;;  %v887_v8 = vmul.f32 %v2957_v4, %v870_v7 }
 0x259   : > { %v904_v9 = vadd.f32 %v896_v2, %v888_v5 }
 0x25a   : > { %v903_v11 = vadd.f32 %v895_v6, %v887_v8  ;;  %v860_v13 = vpop.permute.xlu1 %859 }
 0x25b   : > { %2625 = vtanh.f32 %v904_v9  ;;  %1000 = vst.msk [vmem:[#allocation3 + $0x38] sm:$0xff] %vm451_vm0, %v904_v9  ;;  %v882_v15 = vmul.f32 %v2964_v10, %v860_v13  ;;  %v858_v17 = vpop.permute.xlu0 %857 }
 0x25c   : > { %2627 = vtanh.f32 %v903_v11  ;;  %999 = vst.msk [vmem:[#allocation3 + $0x30] sm:$0xff] %vm451_vm0, %v903_v11  ;;  %v881_v18 = vmul.f32 %v2967_v14, %v858_v17  ;;  %v1006_v17 = vld [vmem:[%s3411_s7 + $0x28] sm:$0xff] }
 0x25d   : > { %v898_v19 = vadd.f32 %v890_v12, %v882_v15  ;;  %v1003_v15 = vld [vmem:[%s3411_s7 + $0x10] sm:$0xff] }
 0x25e   : > { %v897_v21 = vadd.f32 %v889_v16, %v881_v18  ;;  %v864_v23 = vpop.permute.xlu1 %863  ;;  %v1031_v9 = vld [vmem:[#allocation3 + $0x28] sm:$0xff]  ;;  %v1008_v18 = vld [vmem:[%s3411_s7 + $0x38] sm:$0xff] }
 0x25f   : > { %2629 = vtanh.f32 %v898_v19  ;;  %994 = vst.msk [vmem:[#allocation3 + $0x8] sm:$0xff] %vm451_vm0, %v898_v19  ;;  %v884_v25 = vmul.f32 %v2974_v20, %v864_v23  ;;  %v862_v27 = vpop.permute.xlu0 %861  ;;  %v1007_v23 = vld [vmem:[%s3411_s7 + $0x30] sm:$0xff] }
 0x260   : > { %2631 = vtanh.f32 %v897_v21  ;;  %993 = vst.msk [vmem:[#allocation3] sm:$0xff] %vm451_vm0, %v897_v21  ;;  %v883_v28 = vmul.f32 %v2977_v24, %v862_v27  ;;  %v3076_v21 = vpack.c.bf16 %v1008_v18, %v1006_v17 }
 0x261   : > { %v2622_v29 = vpop.eup %2621  ;;  %v900_v30 = vadd.f32 %v892_v22, %v884_v25  ;;  %v1005_v22 = vld [vmem:[%s3411_s7 + $0x20] sm:$0xff] }
 0x262   : > { %v2624_v31 = vpop.eup %2623  ;;  %v899_v32 = vadd.f32 %v891_v26, %v883_v28  ;;  %931 = vrot.lane.b32.xlu1 %v2622_v29, %s2759_s12  ;;  %v3089_v26 = vpack.c.bf16 %v1007_v23, %v1005_v22 }
 0x263   : > { %2633 = vtanh.f32 %v900_v30  ;;  %996 = vst.msk [vmem:[#allocation3 + $0x18] sm:$0xff] %vm451_vm0, %v900_v30  ;;  %929 = vrot.lane.b32.xlu0 %v2624_v31, %s2759_s12  ;;  %v2762_v30 = vmov 0.0|0.0  }
 0x264   : > { %2635 = vtanh.f32 %v899_v32  ;;  %995 = vst.msk [vmem:[#allocation3 + $0x10] sm:$0xff] %vm451_vm0, %v899_v32  ;;  %v1910_v32 = vld [vmem:[%s3413_s9] sm:$0xff] }
 0x265   : > { %v2626_v33 = vpop.eup %2625 }
 0x266   : > { %v2628_v34 = vpop.eup %2627  ;;  %935 = vrot.lane.b32.xlu1 %v2626_v33, %s2759_s12  ;;  %v1911_v33 = vld [vmem:[%s3413_s9 + $0x8] sm:$0xff] }
 0x267   : > { %933 = vrot.lane.b32.xlu0 %v2628_v34, %s2759_s12 }
 0x269   : > { %v2630_v35 = vpop.eup %2629 }
 0x26a   : > { %v2632_v36 = vpop.eup %2631  ;;  %923 = vrot.lane.b32.xlu1 %v2630_v35, %s2759_s12  ;;  %v3108_v35 = vpack.c.bf16 %v1911_v33, %v1910_v32 }
 0x26b   : > { %921 = vrot.lane.b32.xlu0 %v2632_v36, %s2759_s12  ;;  %v1912_v36 = vld [vmem:[%s3413_s9 + $0x10] sm:$0xff] }
 0x26c   : > { %v3119_v39 = vpack.c.bf16 %v1913_v37, %v1912_v36 }
 0x26d   : > { %v2634_v40 = vpop.eup %2633 }
 0x26e   : > { %v2636_v43 = vpop.eup %2635  ;;  %927 = vrot.lane.b32.xlu1 %v2634_v40, %s2759_s12 }
 0x26f   : > { %925 = vrot.lane.b32.xlu0 %v2636_v43, %s2759_s12 }
 0x2d4   : > { %v932_v56 = vpop.permute.xlu1 %931 }
 0x2d5   : > { %v950_v57 = vmul.f32 %v2946_v55, %v932_v56  ;;  %v930_v59 = vpop.permute.xlu0 %929 }
 0x2d6   : > { %v949_v60 = vmul.f32 %v2949_v58, %v930_v59 }
 0x2d7   : > { %971 = vrot.lane.b32.xlu1 %v950_v57, %s2761_s13 }
 0x2d8   : > { %v936_v61 = vpop.permute.xlu1 %935  ;;  %969 = vrot.lane.b32.xlu0 %v949_v60, %s2761_s13  ;;  %v3158_v60 = vrot.slane %v1017_v49, %v1239_v52  ;;  %v1028_v52 = vld [vmem:[#allocation3 + $0x10] sm:$0xff] }
 0x2d9   : > { %v952_v62 = vmul.f32 %v2954_v0, %v936_v61  ;;  %v934_v63 = vpop.permute.xlu0 %933  ;;  %v1033_v0 = vld [vmem:[#allocation3 + $0x38] sm:$0xff] }
 0x2da   : > { %v951_v1 = vmul.f32 %v2957_v4, %v934_v63  ;;  %v1032_v4 = vld [vmem:[#allocation3 + $0x30] sm:$0xff] }
 0x2db   : > { %975 = vrot.lane.b32.xlu1 %v952_v62, %s2761_s13 }
 0x2dc   : > { %v924_v2 = vpop.permute.xlu1 %923  ;;  %973 = vrot.lane.b32.xlu0 %v951_v1, %s2761_s13 }
 0x2dd   : > { %v946_v55 = vmul.f32 %v2964_v10, %v924_v2  ;;  %v922_v3 = vpop.permute.xlu0 %921  ;;  %v1030_v10 = vld [vmem:[#allocation3 + $0x20] sm:$0xff] }
 0x2de   : > { %v945_v5 = vmul.f32 %v2967_v14, %v922_v3  ;;  %v1001_v14 = vld [vmem:[%s3411_s7] sm:$0xff] }
 0x2df   : > { %963 = vrot.lane.b32.xlu1 %v946_v55, %s2761_s13  ;;  %v3074_v19 = vpack.c.bf16 %v1003_v15, %v1001_v14 }
 0x2e0   : > { %v928_v6 = vpop.permute.xlu1 %927  ;;  %961 = vrot.lane.b32.xlu0 %v945_v5, %s2761_s13 }
 0x2e1   : > { %v948_v58 = vmul.f32 %v2974_v20, %v928_v6  ;;  %v926_v7 = vpop.permute.xlu0 %925 }
 0x2e2   : > { %v947_v8 = vmul.f32 %v2977_v24, %v926_v7 }
 0x2e3   : > { %967 = vrot.lane.b32.xlu1 %v948_v58, %s2761_s13 }
 0x2e4   : > { %965 = vrot.lane.b32.xlu0 %v947_v8, %s2761_s13  ;;  %s3176_s13 = scalar_lea.vmem [#allocation4], %s2522_s25  ;;  %s2764_s25 = smov [#allocation4]  }
 0x2e5   : > { %s2135_s26 = sshll.u32 %s3176_s13, 4  ;;  %s2697_s29 = sshll.u32 %s2764_s25, 4  ;;  %s3358_s26 = int_to_ptr.vmem [resolvable:$true] %s2135_s26  ;;  %s2698_s29 = int_to_ptr.vmem [resolvable:$false] %s2697_s29 }
 0x2e6   : > { %s2693_s21 = scalar_lea.vmem %s3358_s26, 1920  ;;  %s2699_s30 = scalar_lea.vmem %s2698_s29, 3840 }
 0x2e7   : > { %1337 = vrot.lane.b32.xlu1 %v1033_v0, %s2759_s12  ;;  %p2694_p11 = scmp.ne.s32.totalorder %s3358_s26, %s2693_s21  ;;  %p2700_p0 = scmp.lt.s32.totalorder %s3358_s26, %s2698_s29 }
 0x2e8   : > { %1335 = vrot.lane.b32.xlu0 %v1032_v4, %s2759_s12  ;;  %p2701_p1 = scmp.lt.s32.totalorder %s2699_s30, %s2693_s21 }
 0x2e9   : > { %p2695_p12 = pnand %p2694_p11, %p2865_p5 }
 0x2ea   : > { %p2702_p2 = por %p2701_p1, %p2700_p0 }
 0x2eb   : > { %1333 = vrot.lane.b32.xlu1 %v1031_v9, %s2759_s12  ;;  %v3171_v9 = vld [vmem:[%s3414_s10] ss:$0 sm:$0xff]  ;;  %p2696_p13 = pneg %p2695_p12 }
 0x2ec   : > { %1331 = vrot.lane.b32.xlu0 %v1030_v10, %s2759_s12 }
 0x2ed   : > { %p2703_p3 = pnand %p2702_p2, %p2696_p13 }
 0x349   : > { %v972_v11 = vpop.permute.xlu1 %971 }
 0x34a   : > { %990 = vst.msk [vmem:[#allocation2 + $0x28] sm:$0xff] %vm451_vm0, %v972_v11  ;;  %v970_v12 = vpop.permute.xlu0 %969 }
 0x34b   : > { %989 = vst.msk [vmem:[#allocation2 + $0x20] sm:$0xff] %vm451_vm0, %v970_v12 }
 0x34d   : > { %v976_v13 = vpop.permute.xlu1 %975 }
 0x34e   : > { %992 = vst.msk [vmem:[#allocation2 + $0x38] sm:$0xff] %vm451_vm0, %v976_v13  ;;  %v974_v16 = vpop.permute.xlu0 %973 }
 0x34f   : > { %991 = vst.msk [vmem:[#allocation2 + $0x30] sm:$0xff] %vm451_vm0, %v974_v16 }
 0x351   : > { %v964_v20 = vpop.permute.xlu1 %963  ;;  %v1023_v29 = vld [vmem:[#allocation2 + $0x28] sm:$0xff] }
 0x352   : > { %986 = vst.msk [vmem:[#allocation2 + $0x8] sm:$0xff] %vm451_vm0, %v964_v20  ;;  %v962_v24 = vpop.permute.xlu0 %961  ;;  %v1022_v25 = vld [vmem:[#allocation2 + $0x20] sm:$0xff] }
 0x353   : > { %985 = vst.msk [vmem:[#allocation2] sm:$0xff] %vm451_vm0, %v962_v24  ;;  %2257 = vmatmul.mubr.msk.f32.vlgmr.msra.gmra.mrb[8].mxu0 %vm451_vm0, %v1022_v25 }
 0x354   : > { %2461 = vmatpush1.bf16.msra.mxu0 %v3074_v19  ;;  %1116 = vmatprep.mubr.f32.mxu0 %v2760_v53 }
 0x355   : > { %v968_v27 = vpop.permute.xlu1 %967  ;;  %2463 = vmatprep.subr.bf16.mxu0 %v3076_v21  ;;  %v1025_v34 = vld [vmem:[#allocation2 + $0x38] sm:$0xff] }
 0x356   : > { %988 = vst.msk [vmem:[#allocation2 + $0x18] sm:$0xff] %vm451_vm0, %v968_v27  ;;  %v966_v28 = vpop.permute.xlu0 %965  ;;  %v1024_v31 = vld [vmem:[#allocation2 + $0x30] sm:$0xff] }
 0x357   : > { %987 = vst.msk [vmem:[#allocation2 + $0x10] sm:$0xff] %vm451_vm0, %v966_v28  ;;  %2258 = vmatmul.mubr.msk.f32.gmra.mrb[10].mxu0 %vm451_vm0, %v1023_v29 }
 0x358   : > { %1122 = vmatprep.mubr.f32.mxu0 %v2760_v53  ;;  %2465 = vmatpush1.bf16.msra.mxu0 %v3089_v26 }
 0x359   : > { %2498 = vmatprep.subr.bf16.mxu0 %v2762_v30  ;;  %v1019_v40 = vld [vmem:[#allocation2 + $0x8] sm:$0xff] }
 0x35a   : > { %v1018_v38 = vld [vmem:[#allocation2] sm:$0xff] }
 0x35b   : > { %2259 = vmatmul.mubr.msk.f32.gmra.mrb[12].mxu0 %vm451_vm0, %v1024_v31 }
 0x35c   : > { %1128 = vmatprep.mubr.f32.mxu0 %v2760_v53 }
 0x35d   : > { %v1021_v43 = vld [vmem:[#allocation2 + $0x18] sm:$0xff] }
 0x35e   : > { %v1020_v42 = vld [vmem:[#allocation2 + $0x10] sm:$0xff] }
 0x35f   : > { %2260 = vmatmul.mubr.msk.f32.gmra.mrb[14].mxu0 %vm451_vm0, %v1025_v34 }
 0x360   : > { %1211 = vmatprep.mubr.f32.mxu0 %v2760_v53 }
 0x363   : > { %2261 = vmatmul.mubr.msk.f32.vlgmr.msra.gmra.mrb[8].mxu0 %vm451_vm0, %v1018_v38 }
 0x364   : > { %1217 = vmatprep.mubr.f32.mxu0 %v2760_v53  ;;  %2500 = vmatpush3.bf16.msra.mxu0 %v3108_v35 }
 0x365   : > { %2501 = vmatprep.subr.bf16.mxu0 %v2762_v30 }
 0x367   : > { %2262 = vmatmul.mubr.msk.f32.gmra.mrb[10].mxu0 %vm451_vm0, %v1019_v40 }
 0x368   : > { %1223 = vmatprep.mubr.f32.mxu0 %v2760_v53  ;;  %2503 = vmatpush3.bf16.msra.mxu0 %v3119_v39 }
 0x36b   : > { %2263 = vmatmul.mubr.msk.f32.gmra.mrb[12].mxu0 %vm451_vm0, %v1020_v42 }
 0x36c   : > { %1229 = vmatprep.mubr.f32.mxu0 %v2760_v53 }
 0x36f   : > { %2264 = vmatmul.mubr.msk.f32.gmra.mrb[14].mxu0 %vm451_vm0, %v1021_v43 }
 0x370   : > { %2389 = vmatprep.mubr.msk.f32.mxu0 %vm2763_vm1, %v2760_v53 }
 0x373   : > { %2390 = vmatmul.mubr.msk.f32.vlgmr.msra.gmra.mrb[16].mxu0 %vm451_vm0, %v1018_v38 }
 0x374   : > { %2392 = vmatprep.mubr.msk.f32.mxu0 %vm2763_vm1, %v2760_v53 }
 0x377   : > { %2393 = vmatmul.mubr.msk.f32.gmra.mrb[18].mxu0 %vm451_vm0, %v1019_v40 }
 0x378   : > { %2395 = vmatprep.mubr.msk.f32.mxu0 %vm2763_vm1, %v2760_v53 }
 0x37b   : > { %2396 = vmatmul.mubr.msk.f32.gmra.mrb[20].mxu0 %vm451_vm0, %v1020_v42 }
 0x37c   : > { %2398 = vmatprep.mubr.msk.f32.mxu0 %vm2763_vm1, %v2760_v53 }
 0x37f   : > { %2399 = vmatmul.mubr.msk.f32.gmra.mrb[22].mxu0 %vm451_vm0, %v1021_v43 }
 0x380   : > { %2401 = vmatprep.mubr.msk.f32.mxu0 %vm2763_vm1, %v2760_v53 }
 0x383   : > { %2402 = vmatmul.mubr.msk.f32.gmra.mrb[24].mxu0 %vm451_vm0, %v1022_v25 }
 0x384   : > { %2404 = vmatprep.mubr.msk.f32.mxu0 %vm2763_vm1, %v2760_v53 }
 0x387   : > { %2405 = vmatmul.mubr.msk.f32.gmra.mrb[26].mxu0 %vm451_vm0, %v1023_v29 }
 0x388   : > { %2407 = vmatprep.mubr.msk.f32.mxu0 %vm2763_vm1, %v2760_v53 }
 0x38b   : > { %2408 = vmatmul.mubr.msk.f32.gmra.mrb[28].mxu0 %vm451_vm0, %v1024_v31 }
 0x38c   : > { %2410 = vmatprep.mubr.msk.f32.mxu0 %vm2763_vm1, %v2760_v53 }
 0x38f   : > { %2411 = vmatmul.mubr.msk.f32.gmra.mrb[30].mxu0 %vm451_vm0, %v1025_v34 }
 0x436   : > { %v1213_v56 = vpop.f32.mrb[8].mxu0 }
 0x437   : > { %v1215_v57 = vpop.f32.mrb[9].mxu0  ;;  %v1247_v63 = vadd.f32 %v3158_v60, %v1213_v56 }
 0x438   : > { %v1248_v59 = vadd.f32 %v3155_v51, %v1215_v57 }
 0x439   : > { %v2265_v5 = vmul.f32 -1.442695, %v1247_v63  ;;  %v1336_v63 = vpop.permute.xlu0 %1335 }
 0x43a   : > { %2637 = vtanh.f32 %v1248_v59  ;;  %v1219_v61 = vpop.f32.mrb[10].mxu0 }
 0x43b   : > { %v1221_v62 = vpop.f32.mrb[11].mxu0  ;;  %v1249_v10 = vadd.f32 %v3158_v60, %v1219_v61 }
 0x43c   : > { %v1250_v45 = vadd.f32 %v3155_v51, %v1221_v62 }
 0x43d   : > { %v2266_v15 = vmul.f32 -1.442695, %v1249_v10 }
 0x43e   : > { %v1225_v1 = vpop.f32.mrb[12].mxu0 }
 0x43f   : > { %v1251_v2 = vadd.f32 %v3158_v60, %v1225_v1  ;;  %v1227_v55 = vpop.f32.mrb[13].mxu0  ;;  %v1029_v1 = vld [vmem:[#allocation3 + $0x18] sm:$0xff] }
 0x440   : > { %v1252_v3 = vadd.f32 %v3155_v51, %v1227_v55 }
 0x441   : > { %v2267_v6 = vmul.f32 -1.442695, %v1251_v2 }
 0x442   : > { %2639 = vtanh.f32 %v1252_v3  ;;  %v1231_v58 = vpop.f32.mrb[14].mxu0 }
 0x443   : > { %2641 = vpow2.f32 %v2267_v6  ;;  %v1253_v7 = vadd.f32 %v3158_v60, %v1231_v58  ;;  %v1233_v8 = vpop.f32.mrb[15].mxu0  ;;  %v1338_v58 = vpop.permute.xlu1 %1337 }
 0x444   : > { %v2638_v0 = vpop.eup %2637  ;;  %v1254_v4 = vadd.f32 %v3155_v51, %v1233_v8  ;;  %2643 = vpow2.f32 %v2265_v5  ;;  %v1026_v8 = vld [vmem:[#allocation3] sm:$0xff] }
 0x445   : > { %v2268_v11 = vmul.f32 -1.442695, %v1253_v7  ;;  %1287 = vrot.lane.b32.xlu1 %v2638_v0, %s2758_s16 }
 0x446   : > { %2645 = vtanh.f32 %v1254_v4  ;;  %v2032_v12 = vpop.f32.mrb[16].mxu0 }
 0x447   : > { %2647 = vpow2.f32 %v2268_v11  ;;  %v2033_v13 = vadd.f32 %v3171_v9, %v2032_v12  ;;  %v2391_v14 = vpop.f32.mrb[17].mxu0  ;;  %v1332_v12 = vpop.permute.xlu0 %1331 }
 0x448   : > { %2649 = vpow2.f32 %v2266_v15 }
 0x449   : > { %2106 = vst [vmem:[%s3176_s13] sm:$0xff] %v2033_v13 }
 0x44a   : > { %v2037_v16 = vpop.f32.mrb[18].mxu0 }
 0x44b   : > { %v2038_v17 = vadd.f32 %v3171_v9, %v2037_v16  ;;  %v2394_v18 = vpop.f32.mrb[19].mxu0  ;;  %v1334_v16 = vpop.permute.xlu1 %1333 }
 0x44c   : > { %v2640_v20 = vpop.eup %2639 }
 0x44d   : > { %v2642_v22 = vpop.eup %2641  ;;  %2107 = vst [vmem:[%s3176_s13 + $0x8] sm:$0xff] %v2038_v17  ;;  %1291 = vrot.lane.b32.xlu0 %v2640_v20, %s2758_s16  ;;  %v1027_v17 = vld [vmem:[#allocation3 + $0x8] sm:$0xff] }
 0x44e   : > { %v1269_v23 = vadd.f32 1.0, %v2642_v22  ;;  %v2042_v24 = vpop.f32.mrb[20].mxu0  ;;  %v2644_v25 = vpop.eup %2643 }
 0x44f   : > { %v2043_v27 = vadd.f32 %v3171_v9, %v2042_v24  ;;  %v2397_v28 = vpop.f32.mrb[21].mxu0  ;;  %v1267_v32 = vadd.f32 1.0, %v2644_v25 }
 0x450   : > { %v2646_v29 = vpop.eup %2645  ;;  %2651 = vrcp.f32 %v1269_v23 }
 0x451   : > { %v2648_v31 = vpop.eup %2647  ;;  %2108 = vst [vmem:[%s3176_s13 + $0x10] sm:$0xff] %v2043_v27  ;;  %1293 = vrot.lane.b32.xlu0 %v2646_v29, %s2758_s16 }
 0x452   : > { %v1270_v33 = vadd.f32 1.0, %v2648_v31  ;;  %v2047_v34 = vpop.f32.mrb[22].mxu0  ;;  %v2650_v40 = vpop.eup %2649 }
 0x453   : > { %v2048_v36 = vadd.f32 %v3171_v9, %v2047_v34  ;;  %v2400_v37 = vpop.f32.mrb[23].mxu0  ;;  %v1268_v48 = vadd.f32 1.0, %v2650_v40 }
 0x454   : > { %2653 = vrcp.f32 %v1270_v33 }
 0x455   : > { %2109 = vst [vmem:[%s3176_s13 + $0x18] sm:$0xff] %v2048_v36  ;;  %2655 = vrcp.f32 %v1267_v32 }
 0x456   : > { %v2052_v38 = vpop.f32.mrb[24].mxu0  ;;  %2657 = vtanh.f32 %v1250_v45 }
 0x457   : > { %v2053_v42 = vadd.f32 %v3171_v9, %v2052_v38  ;;  %v2403_v43 = vpop.f32.mrb[25].mxu0  ;;  %2659 = vrcp.f32 %v1268_v48 }
 0x459   : > { %2110 = vst [vmem:[%s3176_s13 + $0x20] sm:$0xff] %v2053_v42 }
 0x45a   : > { %v3190_v46 = vpop.eup %2651  ;;  %v2057_v49 = vpop.f32.mrb[26].mxu0 }
 0x45b   : > { %v2058_v56 = vadd.f32 %v3171_v9, %v2057_v49  ;;  %v2406_v57 = vpop.f32.mrb[27].mxu0  ;;  %v1305_v59 = vmul.f32 %v3190_v46, %v1028_v52  ;;  %v1345_v5 = vmul.f32 %v3190_v46, %v1336_v63 }
 0x45d   : > { %2111 = vst [vmem:[%s3176_s13 + $0x28] sm:$0xff] %v2058_v56  ;;  %1315 = vrot.lane.b32.xlu1 %v1305_v59, %s2758_s16 }
 0x45e   : > { %v3196_v61 = vpop.eup %2653  ;;  %v2062_v62 = vpop.f32.mrb[28].mxu0 }
 0x45f   : > { %v2063_v2 = vadd.f32 %v3171_v9, %v2062_v62  ;;  %v2409_v55 = vpop.f32.mrb[29].mxu0  ;;  %v1306_v3 = vmul.f32 %v3196_v61, %v1029_v1  ;;  %v3201_v6 = vpop.eup %2655  ;;  %v1346_v10 = vmul.f32 %v3196_v61, %v1338_v58 }
 0x460   : > { %v1303_v11 = vmul.f32 %v3201_v6, %v1026_v8  ;;  %v2658_v13 = vpop.eup %2657  ;;  %v1343_v14 = vmul.f32 %v3201_v6, %v1332_v12 }
 0x461   : > { %2112 = vst [vmem:[%s3176_s13 + $0x30] sm:$0xff] %v2063_v2  ;;  %1317 = vrot.lane.b32.xlu0 %v1306_v3, %s2758_s16  ;;  %1355 = vrot.lane.b32.xlu1 %v1345_v5, %s2759_s12  ;;  %v2660_v15 = vpop.eup %2659 }
 0x462   : > { %v2067_v7 = vpop.f32.mrb[30].mxu0  ;;  %v1304_v18 = vmul.f32 %v2660_v15, %v1027_v17  ;;  %v1344_v20 = vmul.f32 %v2660_v15, %v1334_v16 }
 0x463   : > { %v2068_v0 = vadd.f32 %v3171_v9, %v2067_v7  ;;  %v2412_v4 = vpop.f32.mrb[31].mxu0 }
 0x465   : > { %2113 = vst [vmem:[%s3176_s13 + $0x38] sm:$0xff] %v2068_v0  ;;  %1357 = vrot.lane.b32.xlu0 %v1346_v10, %s2759_s12  ;;  %1311 = vrot.lane.b32.xlu1 %v1303_v11, %s2758_s16 }
 0x469   : > { %1289 = vrot.lane.b32.xlu0 %v2658_v13, %s2758_s16  ;;  %1351 = vrot.lane.b32.xlu1 %v1343_v14, %s2759_s12 }
 0x46d   : > { %1313 = vrot.lane.b32.xlu0 %v1304_v18, %s2758_s16  ;;  %1353 = vrot.lane.b32.xlu1 %v1344_v20, %s2759_s12 }
 0x4b7   : > { %v1288_v23 = vpop.permute.xlu1 %1287 }
 0x4b8   : > { %v1299_v38 = vmul.f32 %v3201_v6, %v1288_v23 }
 0x4bf   : > { %v1292_v22 = vpop.permute.xlu0 %1291 }
 0x4c0   : > { %v1301_v27 = vmul.f32 %v3190_v46, %v1292_v22 }
 0x4c3   : > { %v1294_v24 = vpop.permute.xlu0 %1293 }
 0x4c4   : > { %v1302_v32 = vmul.f32 %v3196_v61, %v1294_v24 }
 0x4cf   : > { %v1316_v25 = vpop.permute.xlu1 %1315 }
 0x4d0   : > { %v1325_v28 = vadd.f32 %v1316_v25, %v1301_v27 }
 0x4d3   : > { %v1356_v29 = vpop.permute.xlu1 %1355  ;;  %v1318_v31 = vpop.permute.xlu0 %1317 }
 0x4d4   : > { %v1365_v33 = vadd.f32 %v1356_v29, %v1325_v28  ;;  %v1326_v34 = vadd.f32 %v1318_v31, %v1302_v32 }
 0x4d6   : > { %2661 = vtanh.f32 %v1365_v33 }
 0x4d7   : > { %v1312_v36 = vpop.permute.xlu1 %1311  ;;  %v1358_v37 = vpop.permute.xlu0 %1357 }
 0x4d8   : > { %v1366_v40 = vadd.f32 %v1358_v37, %v1326_v34  ;;  %v1323_v42 = vadd.f32 %v1312_v36, %v1299_v38 }
 0x4da   : > { %2663 = vtanh.f32 %v1366_v40 }
 0x4db   : > { %v1352_v43 = vpop.permute.xlu1 %1351  ;;  %v1290_v45 = vpop.permute.xlu0 %1289 }
 0x4dc   : > { %v1363_v48 = vadd.f32 %v1352_v43, %v1323_v42  ;;  %v1300_v49 = vmul.f32 %v2660_v15, %v1290_v45 }
 0x4de   : > { %2665 = vtanh.f32 %v1363_v48 }
 0x4df   : > { %v1314_v52 = vpop.permute.xlu0 %1313  ;;  %v1354_v59 = vpop.permute.xlu1 %1353 }
 0x4e0   : > { %v2662_v56 = vpop.eup %2661  ;;  %v1324_v57 = vadd.f32 %v1314_v52, %v1300_v49 }
 0x4e1   : > { %1379 = vrot.lane.b32.xlu0 %v2662_v56, %s2759_s12 }
 0x4e2   : > { %v1364_v63 = vadd.f32 %v1354_v59, %v1324_v57 }
 0x4e4   : > { %v2664_v62 = vpop.eup %2663  ;;  %2667 = vtanh.f32 %v1364_v63 }
 0x4e5   : > { %1381 = vrot.lane.b32.xlu1 %v2664_v62, %s2759_s12 }
 0x4e8   : > { %v2666_v1 = vpop.eup %2665 }
 0x4e9   : > { %1375 = vrot.lane.b32.xlu0 %v2666_v1, %s2759_s12 }
 0x4ee   : > { %v2668_v2 = vpop.eup %2667 }
 0x4ef   : > { %1377 = vrot.lane.b32.xlu1 %v2668_v2, %s2759_s12 }
 0x553   : > { %v1380_v55 = vpop.permute.xlu0 %1379 }
 0x554   : > { %v1389_v3 = vmul.f32 %v3190_v46, %v1380_v55 }
 0x556   : > { %1399 = vrot.lane.b32.xlu0 %v1389_v3, %s2759_s12 }
 0x557   : > { %v1382_v5 = vpop.permute.xlu1 %1381 }
 0x558   : > { %v1390_v58 = vmul.f32 %v3196_v61, %v1382_v5 }
 0x55a   : > { %1401 = vrot.lane.b32.xlu1 %v1390_v58, %s2759_s12 }
 0x55b   : > { %v1376_v7 = vpop.permute.xlu0 %1375 }
 0x55c   : > { %v1387_v8 = vmul.f32 %v3201_v6, %v1376_v7 }
 0x55e   : > { %1395 = vrot.lane.b32.xlu0 %v1387_v8, %s2759_s12 }
 0x561   : > { %v1378_v0 = vpop.permute.xlu1 %1377 }
 0x562   : > { %v1388_v4 = vmul.f32 %v2660_v15, %v1378_v0  ;;  %1421 = vrot.lane.b32.xlu0 %v1366_v40, %s2758_s16 }
 0x564   : > { %1397 = vrot.lane.b32.xlu1 %v1388_v4, %s2759_s12 }
 0x566   : > { %1417 = vrot.lane.b32.xlu0 %v1364_v63, %s2758_s16 }
 0x568   : > { %1419 = vrot.lane.b32.xlu1 %v1365_v33, %s2758_s16 }
 0x56c   : > { %1415 = vrot.lane.b32.xlu1 %v1363_v48, %s2758_s16 }
 0x5c8   : > { %v1400_v46 = vpop.permute.xlu0 %1399 }
 0x5c9   : > { %1409 = vst.msk [vmem:[#allocation2 + $0x50] sm:$0xff] %vm451_vm0, %v1400_v46 }
 0x5cc   : > { %v1402_v61 = vpop.permute.xlu1 %1401 }
 0x5cd   : > { %1410 = vst.msk [vmem:[#allocation2 + $0x58] sm:$0xff] %vm451_vm0, %v1402_v61 }
 0x5d0   : > { %v1396_v6 = vpop.permute.xlu0 %1395  ;;  %v3237_v10 = vld [vmem:[#allocation2 + $0x50] sm:$0xff] }
 0x5d1   : > { %1407 = vst.msk [vmem:[#allocation2 + $0x40] sm:$0xff] %vm451_vm0, %v1396_v6  ;;  %2269 = vmatmul.mubr.msk.f32.vlgmr.msra.gmra.mrb[8].mxu1 %vm451_vm0, %v3237_v10 }
 0x5d2   : > { %2477 = vmatpush1.bf16.msra.mxu1 %v3074_v19  ;;  %1515 = vmatprep.mubr.f32.mxu1 %v2760_v53 }
 0x5d3   : > { %2479 = vmatprep.subr.bf16.mxu1 %v3076_v21 }
 0x5d4   : > { %v1422_v11 = vpop.permute.xlu0 %1421  ;;  %v3245_v12 = vld [vmem:[#allocation2 + $0x58] sm:$0xff] }
 0x5d5   : > { %1430 = vst.msk [vmem:[#allocation3 + $0x58] sm:$0xff] %vm451_vm0, %v1422_v11  ;;  %2270 = vmatmul.mubr.msk.f32.gmra.mrb[10].mxu1 %vm451_vm0, %v3245_v12 }
 0x5d6   : > { %v1398_v13 = vpop.permute.xlu1 %1397  ;;  %2481 = vmatpush1.bf16.msra.mxu1 %v3089_v26  ;;  %1592 = vmatprep.mubr.f32.mxu1 %v2760_v53 }
 0x5d7   : > { %1408 = vst.msk [vmem:[#allocation2 + $0x48] sm:$0xff] %vm451_vm0, %v1398_v13  ;;  %2483 = vmatprep.subr.bf16.mxu1 %v3001_v41 }
 0x5d8   : > { %v1418_v14 = vpop.permute.xlu0 %1417  ;;  %v3254_v15 = vld [vmem:[#allocation2 + $0x40] sm:$0xff] }
 0x5d9   : > { %1428 = vst.msk [vmem:[#allocation3 + $0x48] sm:$0xff] %vm451_vm0, %v1418_v14  ;;  %2271 = vmatmul.mubr.msk.f32.vlgmr.msra.gmra.mrb[8].mxu1 %vm451_vm0, %v3254_v15 }
 0x5da   : > { %v1420_v16 = vpop.permute.xlu1 %1419  ;;  %1598 = vmatprep.mubr.f32.mxu1 %v2760_v53  ;;  %2485 = vmatpush1.bf16.msra.mxu1 %v3007_v44 }
 0x5db   : > { %1429 = vst.msk [vmem:[#allocation3 + $0x50] sm:$0xff] %vm451_vm0, %v1420_v16  ;;  %2487 = vmatprep.subr.bf16.mxu1 %v3020_v47 }
 0x5dc   : > { %v1438_v17 = vld [vmem:[#allocation3 + $0x58] sm:$0xff] }
 0x5dd   : > { %1649 = vrot.lane.b32.xlu0 %v1438_v17, %s2759_s12 }
 0x5de   : > { %v1416_v41 = vpop.permute.xlu1 %1415  ;;  %v3264_v18 = vld [vmem:[#allocation2 + $0x48] sm:$0xff]  ;;  %2489 = vmatpush1.bf16.msra.mxu1 %v3028_v50 }
 0x5df   : > { %1427 = vst.msk [vmem:[#allocation3 + $0x40] sm:$0xff] %vm451_vm0, %v1416_v41  ;;  %2272 = vmatmul.mubr.msk.f32.gmra.mrb[10].mxu1 %vm451_vm0, %v3264_v18  ;;  %2491 = vmatprep.subr.bf16.mxu1 %v3041_v54 }
 0x5e0   : > { %1768 = vmatprep.mubr.f32.mxu1 %v2760_v53  ;;  %v1436_v38 = vld [vmem:[#allocation3 + $0x48] sm:$0xff] }
 0x5e2   : > { %v1437_v44 = vld [vmem:[#allocation3 + $0x50] sm:$0xff] }
 0x5e3   : > { %1647 = vrot.lane.b32.xlu1 %v1437_v44, %s2759_s12 }
 0x5e6   : > { %v1435_v45 = vld [vmem:[#allocation3 + $0x40] sm:$0xff] }
 0x64f   : > { %v1650_v37 = vpop.permute.xlu0 %1649 }
 0x655   : > { %v1648_v52 = vpop.permute.xlu1 %1647 }
 0x6ac   : > { %v1594_v47 = vpop.f32.mrb[8].mxu1 }
 0x6ad   : > { %v1605_v20 = vadd.f32 %v1594_v47, %v3158_v60  ;;  %v1596_v22 = vpop.f32.mrb[9].mxu1 }
 0x6ae   : > { %v1606_v34 = vadd.f32 %v1596_v22, %v3155_v51 }
 0x6af   : > { %v2273_v23 = vmul.f32 -1.442695, %v1605_v20 }
 0x6b1   : > { %2669 = vpow2.f32 %v2273_v23 }
 0x6b2   : > { %v1600_v24 = vpop.f32.mrb[10].mxu1 }
 0x6b3   : > { %v1607_v50 = vadd.f32 %v1600_v24, %v3158_v60  ;;  %v1602_v25 = vpop.f32.mrb[11].mxu1 }
 0x6b4   : > { %v1608_v27 = vadd.f32 %v1602_v25, %v3155_v51 }
 0x6b5   : > { %v2274_v28 = vmul.f32 -1.442695, %v1607_v50 }
 0x6b6   : > { %2671 = vtanh.f32 %v1608_v27 }
 0x6b7   : > { %2673 = vpow2.f32 %v2274_v28 }
 0x6bb   : > { %v2670_v54 = vpop.eup %2669 }
 0x6bc   : > { %v1615_v32 = vadd.f32 1.0, %v2670_v54 }
 0x6c0   : > { %v2672_v29 = vpop.eup %2671 }
 0x6c1   : > { %v2674_v31 = vpop.eup %2673  ;;  %1627 = vrot.lane.b32.xlu0 %v2672_v29, %s2758_s16 }
 0x6c2   : > { %v1616_v33 = vadd.f32 1.0, %v2674_v31 }
 0x6c4   : > { %2675 = vrcp.f32 %v1616_v33 }
 0x6c5   : > { %2677 = vrcp.f32 %v1615_v32 }
 0x6c6   : > { %2679 = vtanh.f32 %v1606_v34 }
 0x6ce   : > { %v2676_v36 = vpop.eup %2675 }
 0x6cf   : > { %v1634_v40 = vmul.f32 %v2676_v36, %v1436_v38  ;;  %v1654_v42 = vmul.f32 %v2676_v36, %v1650_v37  ;;  %v2678_v43 = vpop.eup %2677 }
 0x6d0   : > { %v1633_v48 = vmul.f32 %v2678_v43, %v1435_v45  ;;  %v2680_v49 = vpop.eup %2679  ;;  %v1653_v56 = vmul.f32 %v2678_v43, %v1648_v52 }
 0x6d1   : > { %1639 = vrot.lane.b32.xlu1 %v1634_v40, %s2758_s16  ;;  %1659 = vrot.lane.b32.xlu0 %v1654_v42, %s2759_s12 }
 0x6d5   : > { %1625 = vrot.lane.b32.xlu1 %v2680_v49, %s2758_s16  ;;  %1637 = vrot.lane.b32.xlu0 %v1633_v48, %s2758_s16 }
 0x6d9   : > { %1657 = vrot.lane.b32.xlu1 %v1653_v56, %s2759_s12 }
 0x733   : > { %v1628_v57 = vpop.permute.xlu0 %1627 }
 0x734   : > { %v1632_v59 = vmul.f32 %v2676_v36, %v1628_v57 }
 0x743   : > { %v1640_v63 = vpop.permute.xlu1 %1639  ;;  %v1660_v62 = vpop.permute.xlu0 %1659 }
 0x744   : > { %v1644_v1 = vadd.f32 %v1640_v63, %v1632_v59 }
 0x746   : > { %v1664_v2 = vadd.f32 %v1660_v62, %v1644_v1 }
 0x747   : > { %v1626_v55 = vpop.permute.xlu1 %1625  ;;  %v1638_v5 = vpop.permute.xlu0 %1637 }
 0x748   : > { %2681 = vtanh.f32 %v1664_v2  ;;  %v1631_v3 = vmul.f32 %v2678_v43, %v1626_v55 }
 0x74a   : > { %v1643_v58 = vadd.f32 %v1638_v5, %v1631_v3 }
 0x74b   : > { %v1658_v7 = vpop.permute.xlu1 %1657 }
 0x74c   : > { %v1663_v8 = vadd.f32 %v1658_v7, %v1643_v58 }
 0x74e   : > { %2683 = vtanh.f32 %v1663_v8 }
 0x752   : > { %v2682_v0 = vpop.eup %2681 }
 0x753   : > { %1671 = vrot.lane.b32.xlu0 %v2682_v0, %s2759_s12 }
 0x758   : > { %v2684_v4 = vpop.eup %2683 }
 0x759   : > { %1669 = vrot.lane.b32.xlu1 %v2684_v4, %s2759_s12 }
 0x7c5   : > { %v1672_v46 = vpop.permute.xlu0 %1671 }
 0x7c6   : > { %v1676_v61 = vmul.f32 %v2676_v36, %v1672_v46 }
 0x7c8   : > { %1681 = vrot.lane.b32.xlu0 %v1676_v61, %s2759_s12 }
 0x7cb   : > { %v1670_v6 = vpop.permute.xlu1 %1669 }
 0x7cc   : > { %v1675_v11 = vmul.f32 %v2678_v43, %v1670_v6  ;;  %1691 = vrot.lane.b32.xlu0 %v1664_v2, %s2758_s16 }
 0x7ce   : > { %1679 = vrot.lane.b32.xlu1 %v1675_v11, %s2759_s12 }
 0x7d2   : > { %1689 = vrot.lane.b32.xlu1 %v1663_v8, %s2758_s16 }
 0x83a   : > { %v1682_v13 = vpop.permute.xlu0 %1681 }
 0x83b   : > { %1686 = vst.msk [vmem:[#allocation2 + $0x68] sm:$0xff] %vm451_vm0, %v1682_v13 }
 0x83e   : > { %v1692_v14 = vpop.permute.xlu0 %1691 }
 0x83f   : > { %1696 = vst.msk [vmem:[#allocation3 + $0x68] sm:$0xff] %vm451_vm0, %v1692_v14 }
 0x840   : > { %v1680_v16 = vpop.permute.xlu1 %1679 }
 0x841   : > { %1685 = vst.msk [vmem:[#allocation2 + $0x60] sm:$0xff] %vm451_vm0, %v1680_v16 }
 0x842   : > { %v1698_v17 = vld [vmem:[#allocation2 + $0x68] sm:$0xff] }
 0x843   : > { %2275 = vmatmul.mubr.msk.f32.vlgmr.msra.gmra.mrb[12].mxu1 %vm451_vm0, %v1698_v17 }
 0x844   : > { %2493 = vmatpush1.bf16.msra.mxu1 %v3074_v19  ;;  %v1690_v41 = vpop.permute.xlu1 %1689  ;;  %1842 = vmatprep.mubr.f32.mxu1 %v2760_v53 }
 0x845   : > { %1695 = vst.msk [vmem:[#allocation3 + $0x60] sm:$0xff] %vm451_vm0, %v1690_v41  ;;  %2495 = vmatprep.subr.bf16.mxu1 %v3076_v21 }
 0x846   : > { %v1700_v44 = vld [vmem:[#allocation3 + $0x68] sm:$0xff] }
 0x847   : > { %1870 = vrot.lane.b32.xlu0 %v1700_v44, %s2759_s12 }
 0x848   : > { %2497 = vmatpush1.bf16.msra.mxu1 %v3089_v26  ;;  %v1697_v47 = vld [vmem:[#allocation2 + $0x60] sm:$0xff] }
 0x849   : > { %2504 = vmatprep.subr.bf16.mxu1 %v2762_v30 }
 0x84b   : > { %2276 = vmatmul.mubr.msk.f32.vlgmr.msra.gmra.mrb[12].mxu1 %vm451_vm0, %v1697_v47 }
 0x84c   : > { %2506 = vmatpush3.bf16.msra.mxu1 %v3108_v35  ;;  %2413 = vmatprep.mubr.msk.f32.mxu1 %vm2763_vm1, %v2760_v53  ;;  %v1699_v34 = vld [vmem:[#allocation3 + $0x60] sm:$0xff] }
 0x84d   : > { %2505 = vmatprep.subr.bf16.mxu1 %v2762_v30 }
 0x850   : > { %2507 = vmatpush3.bf16.msra.mxu1 %v3119_v39 }
 0x853   : > { %2414 = vmatmul.mubr.msk.f32.vlgmr.msra.gmra.mrb[14].mxu1 %vm451_vm0, %v3254_v15 }
 0x854   : > { %2416 = vmatprep.mubr.msk.f32.mxu1 %vm2763_vm1, %v2760_v53 }
 0x857   : > { %2417 = vmatmul.mubr.msk.f32.gmra.mrb[16].mxu1 %vm451_vm0, %v3264_v18 }
 0x858   : > { %2419 = vmatprep.mubr.msk.f32.mxu1 %vm2763_vm1, %v2760_v53 }
 0x85b   : > { %2420 = vmatmul.mubr.msk.f32.gmra.mrb[18].mxu1 %vm451_vm0, %v3237_v10 }
 0x85c   : > { %2422 = vmatprep.mubr.msk.f32.mxu1 %vm2763_vm1, %v2760_v53 }
 0x85f   : > { %2423 = vmatmul.mubr.msk.f32.gmra.mrb[20].mxu1 %vm451_vm0, %v3245_v12 }
 0x860   : > { %2425 = vmatprep.mubr.msk.f32.mxu1 %vm2763_vm1, %v2760_v53 }
 0x863   : > { %2426 = vmatmul.mubr.msk.f32.gmra.mrb[22].mxu1 %vm451_vm0, %v1697_v47 }
 0x864   : > { %2428 = vmatprep.mubr.msk.f32.mxu1 %vm2763_vm1, %v2760_v53 }
 0x867   : > { %2429 = vmatmul.mubr.msk.f32.gmra.mrb[24].mxu1 %vm451_vm0, %v1698_v17 }
 0x868   : > { %2431 = vmatprep.mubr.msk.f32.mxu1 %vm2763_vm1, %v2760_v53 }
 0x8b9   : > { %v1871_v32 = vpop.permute.xlu0 %1870 }
 0x91e   : > { %v1844_v19 = vpop.f32.mrb[12].mxu1 }
 0x91f   : > { %v1849_v21 = vadd.f32 %v1844_v19, %v3158_v60  ;;  %v1846_v26 = vpop.f32.mrb[13].mxu1 }
 0x920   : > { %v1850_v30 = vadd.f32 %v1846_v26, %v3155_v51 }
 0x921   : > { %v2277_v35 = vmul.f32 -1.442695, %v1849_v21 }
 0x922   : > { %2685 = vtanh.f32 %v1850_v30 }
 0x923   : > { %2687 = vpow2.f32 %v2277_v35 }
 0x926   : > { %v2072_v39 = vpop.f32.mrb[14].mxu1 }
 0x927   : > { %v2073_v10 = vadd.f32 %v3171_v9, %v2072_v39  ;;  %v2415_v12 = vpop.f32.mrb[15].mxu1 }
 0x929   : > { %2114 = vst [vmem:[%s3176_s13 + $0x40] sm:$0xff] %v2073_v10 }
 0x92a   : > { %v2077_v15 = vpop.f32.mrb[16].mxu1 }
 0x92b   : > { %v2078_v53 = vadd.f32 %v3171_v9, %v2077_v15  ;;  %v2418_v18 = vpop.f32.mrb[17].mxu1 }
 0x92c   : > { %v2686_v20 = vpop.eup %2685 }
 0x92d   : > { %v2688_v22 = vpop.eup %2687  ;;  %2115 = vst [vmem:[%s3176_s13 + $0x48] sm:$0xff] %v2078_v53  ;;  %1859 = vrot.lane.b32.xlu1 %v2686_v20, %s2758_s16 }
 0x92e   : > { %v1854_v51 = vadd.f32 1.0, %v2688_v22  ;;  %v2082_v60 = vpop.f32.mrb[18].mxu1 }
 0x92f   : > { %v2083_v23 = vadd.f32 %v3171_v9, %v2082_v60  ;;  %v2421_v24 = vpop.f32.mrb[19].mxu1 }
 0x930   : > { %2689 = vrcp.f32 %v1854_v51 }
 0x931   : > { %2116 = vst [vmem:[%s3176_s13 + $0x50] sm:$0xff] %v2083_v23 }
 0x932   : > { %v2087_v50 = vpop.f32.mrb[20].mxu1 }
 0x933   : > { %v2088_v25 = vadd.f32 %v3171_v9, %v2087_v50  ;;  %v2424_v27 = vpop.f32.mrb[21].mxu1 }
 0x935   : > { %2117 = vst [vmem:[%s3176_s13 + $0x58] sm:$0xff] %v2088_v25 }
 0x936   : > { %v2092_v28 = vpop.f32.mrb[22].mxu1 }
 0x937   : > { %v2093_v54 = vadd.f32 %v3171_v9, %v2092_v28  ;;  %v2427_v29 = vpop.f32.mrb[23].mxu1 }
 0x939   : > { %2118 = vst [vmem:[%s3176_s13 + $0x60] sm:$0xff] %v2093_v54 }
 0x93a   : > { %v2690_v31 = vpop.eup %2689  ;;  %v2097_v33 = vpop.f32.mrb[24].mxu1 }
 0x93b   : > { %v2098_v36 = vadd.f32 %v3171_v9, %v2097_v33  ;;  %v2430_v37 = vpop.f32.mrb[25].mxu1  ;;  %v1863_v38 = vmul.f32 %v2690_v31, %v1699_v34  ;;  %v1873_v40 = vmul.f32 %v2690_v31, %v1871_v32 }
 0x93d   : > { %2119 = vst [vmem:[%s3176_s13 + $0x68] sm:$0xff] %v2098_v36  ;;  %1865 = vrot.lane.b32.xlu0 %v1863_v38, %s2758_s16  ;;  %1875 = vrot.lane.b32.xlu1 %v1873_v40, %s2759_s12 }
 0x99f   : > { %v1860_v42 = vpop.permute.xlu1 %1859 }
 0x9a0   : > { %v1862_v43 = vmul.f32 %v2690_v31, %v1860_v42 }
 0x9af   : > { %v1866_v45 = vpop.permute.xlu0 %1865  ;;  %v1876_v49 = vpop.permute.xlu1 %1875 }
 0x9b0   : > { %v1868_v48 = vadd.f32 %v1866_v45, %v1862_v43 }
 0x9b2   : > { %v1878_v52 = vadd.f32 %v1876_v49, %v1868_v48 }
 0x9b4   : > { %2691 = vtanh.f32 %v1878_v52 }
 0x9be   : > { %v2692_v56 = vpop.eup %2691 }
 0x9bf   : > { %1881 = vrot.lane.b32.xlu0 %v2692_v56, %s2759_s12 }
 0x9c3   : > { %1891 = vrot.lane.b32.xlu0 %v1878_v52, %s2758_s16  ;;  %s3355_s16 = scalar_lea.hbm %s3415_s11, %s2297_s14 }
 0xa31   : > { %v1882_v57 = vpop.permute.xlu0 %1881 }
 0xa32   : > { %v1884_v59 = vmul.f32 %v2690_v31, %v1882_v57 }
 0xa34   : > { %1886 = vrot.lane.b32.xlu1 %v1884_v59, %s2759_s12  ;;  %s3363_s12 = scalar_lea.sflag [#allocation5], %s410_s24 }
 0xa35   : > { %v1892_v63 = vpop.permute.xlu0 %1891 }
 0xaa6   : > { %v1887_v62 = vpop.permute.xlu1 %1886 }
 0xaa7   : > { %1889 = vst.msk [vmem:[#allocation2 + $0x70] sm:$0xff] %vm451_vm0, %v1887_v62 }
 0xaae   : > { %v1909_v1 = vld [vmem:[#allocation2 + $0x70] sm:$0xff] }
 0xaaf   : > { %2432 = vmatmul.mubr.msk.f32.gmra.mrb[26].mxu1 %vm451_vm0, %v1909_v1 }
 0xb82   : > { %v2102_v2 = vpop.f32.mrb[26].mxu1 }
 0xb83   : > { %v2103_v55 = vadd.f32 %v3171_v9, %v2102_v2  ;;  %v2433_v3 = vpop.f32.mrb[27].mxu1 }
 0xb85   : > { %2120 = vst [vmem:[%s3176_s13 + $0x70] sm:$0xff] %v2103_v55 }
 0xb86   : > { %2706 = shalt.err (!%p2703_p3)
}
 0xb87   : > { %s2707_s24 = scalar_lea.hbm %s3355_s16, 1920  ;;  %s2711_s15 = scalar_lea.hbm %s3415_s11, 3840 }
 0xb88   : > { %p2708_p4 = scmp.ne.s32.totalorder %s3355_s16, %s2707_s24  ;;  %p2712_p9 = scmp.lt.u32.totalorder %s3355_s16, %s3415_s11 }
 0xb89   : > { %p2713_p10 = scmp.lt.u32.totalorder %s2711_s15, %s2707_s24  ;;  %p2715_p12 = scmp.lt.u32.totalorder %s2707_s24, %s3355_s16 }
 0xb8a   : > { %p2709_p7 = pnand %p2708_p4, %p2865_p5 }
 0xb8b   : > { %p2714_p11 = por %p2713_p10, %p2712_p9 }
 0xb8c   : > { %p2710_p8 = pneg %p2709_p7 }
 0xb8d   : > { %p2716_p13 = por %p2715_p12, %p2714_p11 }
 0xb8f   : > { %p2717_p0 = pnand %p2716_p13, %p2710_p8 }
 0xb91   : > { %2720 = shalt.err (!%p2717_p0)
}
 0xb92   : > { %s2765_s21 = smov 128   ;;  %s2766_s29 = smov 8  }
 0xb93   : > { %2523 = dma.vmem_to_hbm [thread:$0]  (%p2865_p5), %s3358_s26, 1920, %s3355_s16, %s3363_s12, %s2765_s21, %s2765_s21, %s2766_s29  }
 0xb94 PF: > { %p2529_p1 = scmp.ge.s32.totalorder %s2755_s20, 2  ;;  %s2150_s30 = sand.u32 1, %s2743_s17  }
 0xb95   : > { %s2151_s24 = scalar_lea.sflag [#allocation5], %s2150_s30 }
 0xb96   : > { %p2526_p2 = pnand %p2529_p1, %p2869_p6 }
 0xb98   : > { %2738 = dma.done.wait (!%p2526_p2), %s2151_s24, 1920  }
 0xb99   : > { %2740 = vsyncadd (!%p2526_p2), %s2151_s24, 4294965376  ;;  %s3419_s13 = sld [smem:[#allocation7_spill]]  ;;  %p21_p3 = scmp.ge.s32.totalorder %s2852_s23, 4  }
 0xb9a   : > { %s3420_s17 = smov %s2747_s18  ;;  %s3421_s18 = smov %s2751_s19 }
 0xb9b   : > { %s3423_s20 = smov %s2852_s23  ;;  %23 = sbr.rel (!%p21_p3) target bundleno = 3 (0x3), region = 105 }
 0xb9f   : > { %s3422_s19 = smov %s3419_s13 }
 0xba2   :  { %2156 = vsyncpa [#allocation5], 1 }
 0xba3   :  { %2158 = vsyncpa [#allocation5 + $0x1], 1 }

</bundles_post_ra>
